<compile_context>
chip_gen: v5e
topology: v5e:2x2
jax: 0.10.0
libtpu: 0.0.40
codegen_flags: <defaults>
</compile_context>

<pallas_src>
import jax
import jax.numpy as jnp
from jax.experimental import pallas as pl
from jax.experimental.pallas import tpu as pltpu

# ---- model hyper-parameters (consistent with the module) --------------------
Z_SIZE    = 32                     # latent size
N_CLASSES = 10                     # one-hot label dim concatenated to z
IN_DIM    = Z_SIZE + N_CLASSES     # 42
HS_G1     = 64
HS_G2     = 128
HS_G3     = 256
XOUT      = 784                    # 28*28 FashionMNIST pixels

BM_MAX    = 128                    # batch tile: >=2 tiles at B=256 (v7x megacore)


def _round_up(x, m):
    return (x + m - 1) // m * m


def _generator_kernel(z_ref, w1_ref, w2_ref, w3_ref,
                      b1_ref, b2_ref, b3_ref, w4_ref, b4_ref, out_ref):
    """Grid = (batch_tiles,).  One step computes the full 4-layer MLP for one
    (bm, IN_DIM) batch tile and writes the full-width (bm, 784) output tile."""

    def lrelu(x):
        # LeakyReLU(0.2): max(x, 0.2*x)  (2 VPU ops, no select)
        return jnp.maximum(x, 0.2 * x)

    def mm(a, w_ref):
        # bf16 x bf16 on the MXU, f32 accumulation.
        return jnp.dot(a.astype(jnp.bfloat16), w_ref[...],
                       preferred_element_type=jnp.float32)

    h = lrelu(mm(z_ref[...], w1_ref) + b1_ref[...])
    h = lrelu(mm(h, w2_ref) + b2_ref[...])
    h = lrelu(mm(h, w3_ref) + b3_ref[...])
    o = mm(h, w4_ref) + b4_ref[...]
    out_ref[...] = jnp.tanh(o).astype(out_ref.dtype)


def gan_conditional_forward(z, params):
    """z: (B, IN_DIM) float32 -> (B, XOUT) float32."""
    w1, b1, w2, b2, w3, b3, w4, b4 = params
    B = z.shape[0]
    bm = min(BM_MAX, _round_up(B, 8))
    Bp = _round_up(B, bm)
    if Bp != B:
        z = jnp.pad(z, ((0, Bp - B), (0, 0)))

    grid = (Bp // bm,)

    flops = 2 * Bp * (IN_DIM * HS_G1 + HS_G1 * HS_G2
                      + HS_G2 * HS_G3 + HS_G3 * XOUT)
    bytes_accessed = int(z.size * z.dtype.itemsize
                         + sum(int(p.size) * p.dtype.itemsize for p in params)
                         + Bp * XOUT * 4)

    out = pl.pallas_call(
        _generator_kernel,
        out_shape=jax.ShapeDtypeStruct((Bp, XOUT), jnp.float32),
        grid_spec=pltpu.PrefetchScalarGridSpec(
            num_scalar_prefetch=0,
            grid=grid,
            in_specs=[
                pl.BlockSpec((bm, IN_DIM), lambda i: (i, 0)),       # z batch tile
                pl.BlockSpec((IN_DIM, HS_G1), lambda i: (0, 0)),    # w1 (bf16)
                pl.BlockSpec((HS_G1, HS_G2), lambda i: (0, 0)),     # w2 (bf16)
                pl.BlockSpec((HS_G2, HS_G3), lambda i: (0, 0)),     # w3 (bf16)
                pl.BlockSpec((1, HS_G1), lambda i: (0, 0)),         # b1
                pl.BlockSpec((1, HS_G2), lambda i: (0, 0)),         # b2
                pl.BlockSpec((1, HS_G3), lambda i: (0, 0)),         # b3
                pl.BlockSpec((HS_G3, XOUT), lambda i: (0, 0)),      # w4 (bf16), full width
                pl.BlockSpec((1, XOUT), lambda i: (0, 0)),          # b4
            ],
            out_specs=pl.BlockSpec((bm, XOUT), lambda i: (i, 0)),
        ),
        compiler_params=pltpu.CompilerParams(
            dimension_semantics=("parallel",)),
        cost_estimate=pl.CostEstimate(
            flops=flops,
            transcendentals=Bp * XOUT,
            bytes_accessed=bytes_accessed),
    )(z, w1, w2, w3, b1, b2, b3, w4, b4)

    return out[:B] if Bp != B else out


def init_params(key):
    """nn.Linear-style init (U[-1/sqrt(fan_in), +1/sqrt(fan_in)]); weights are
    stored in bf16 for HBM->VMEM traffic, biases stay f32 (1, H)."""
    def linear(key, fan_in, fan_out):
        kw, kb = jax.random.split(key)
        bound = 1.0 / jnp.sqrt(fan_in)
        w = jax.random.uniform(kw, (fan_in, fan_out), jnp.float32, -bound, bound)
        b = jax.random.uniform(kb, (1, fan_out), jnp.float32, -bound, bound)
        return w.astype(jnp.bfloat16), b

    k1, k2, k3, k4 = jax.random.split(key, 4)
    w1, b1 = linear(k1, IN_DIM, HS_G1)
    w2, b2 = linear(k2, HS_G1, HS_G2)
    w3, b3 = linear(k3, HS_G2, HS_G3)
    w4, b4 = linear(k4, HS_G3, XOUT)
    return (w1, b1, w2, b2, w3, b3, w4, b4)


def reference_forward(z, params):
    """Plain-JAX reference of the same (bf16-weight) forward pass."""
    w1, b1, w2, b2, w3, b3, w4, b4 = params
    lrelu = lambda x: jnp.maximum(x, 0.2 * x)
    mm = lambda a, w: jnp.dot(a.astype(jnp.bfloat16), w,
                              preferred_element_type=jnp.float32)
    h = lrelu(mm(z, w1) + b1)
    h = lrelu(mm(h, w2) + b2)
    h = lrelu(mm(h, w3) + b3)
    return jnp.tanh(mm(h, w4) + b4)


if __name__ == "__main__":
    key = jax.random.PRNGKey(0)
    k_params, k_z, k_lbl = jax.random.split(key, 3)

    params = init_params(k_params)

    # Conditional input: noise concatenated with a one-hot class label, exactly
    # like `torch.cat((torch.randn(B, z_size), one_hot(y)), axis=-1)`.
    # Batch of 256 amortizes weight DMA / launch overhead and gives grid=(2,)
    # so both v7x TensorCores get a tile.
    BATCH = 256
    noise = jax.random.normal(k_z, (BATCH, Z_SIZE), jnp.float32)
    labels = jax.random.randint(k_lbl, (BATCH,), 0, N_CLASSES)
    one_hot = jax.nn.one_hot(labels, N_CLASSES, dtype=jnp.float32)
    z = jnp.concatenate([noise, one_hot], axis=-1)          # (BATCH, IN_DIM)

    out = gan_conditional_forward(z, params)
    out = jax.block_until_ready(out)

    ref = reference_forward(z, params)
    assert out.shape == (BATCH, XOUT), out.shape
    assert bool(jnp.allclose(out, ref, atol=5e-3, rtol=5e-3)), "mismatch vs reference"

    print("KERNEL_OK")
</pallas_src>

<mosaic_0001>
module attributes {stable_mosaic.version = 11 : i64} {
  func.func @_generator_kernel(%arg0: i32, %arg1: memref<128x42xf32, #tpu.memory_space<vmem>>, %arg2: memref<42x64xbf16, #tpu.memory_space<vmem>>, %arg3: memref<64x128xbf16, #tpu.memory_space<vmem>>, %arg4: memref<128x256xbf16, #tpu.memory_space<vmem>>, %arg5: memref<1x64xf32, #tpu.memory_space<vmem>>, %arg6: memref<1x128xf32, #tpu.memory_space<vmem>>, %arg7: memref<1x256xf32, #tpu.memory_space<vmem>>, %arg8: memref<256x784xbf16, #tpu.memory_space<vmem>>, %arg9: memref<1x784xf32, #tpu.memory_space<vmem>>, %arg10: memref<128x784xf32, #tpu.memory_space<vmem>>) attributes {dimension_semantics = [#tpu.dimension_semantics<parallel>], iteration_bounds = array<i64: 2>, scalar_prefetch = 0 : i64, scratch_operands = 0 : i64, tpu.core_type = #tpu.core_type<tc>, window_params = [{transform_indices = @transform_0, window_bounds = array<i64: 128, 42>}, {pipeline_mode = #tpu.pipeline_mode<synchronous>, transform_indices = @transform_1, window_bounds = array<i64: 42, 64>}, {pipeline_mode = #tpu.pipeline_mode<synchronous>, transform_indices = @transform_2, window_bounds = array<i64: 64, 128>}, {pipeline_mode = #tpu.pipeline_mode<synchronous>, transform_indices = @transform_3, window_bounds = array<i64: 128, 256>}, {pipeline_mode = #tpu.pipeline_mode<synchronous>, transform_indices = @transform_4, window_bounds = array<i64: 1, 64>}, {pipeline_mode = #tpu.pipeline_mode<synchronous>, transform_indices = @transform_5, window_bounds = array<i64: 1, 128>}, {pipeline_mode = #tpu.pipeline_mode<synchronous>, transform_indices = @transform_6, window_bounds = array<i64: 1, 256>}, {pipeline_mode = #tpu.pipeline_mode<synchronous>, transform_indices = @transform_7, window_bounds = array<i64: 256, 784>}, {pipeline_mode = #tpu.pipeline_mode<synchronous>, transform_indices = @transform_8, window_bounds = array<i64: 1, 784>}, {transform_indices = @transform_9, window_bounds = array<i64: 128, 784>}]} {
    %c0 = arith.constant 0 : index
    %c0_0 = arith.constant 0 : index
    %0 = vector.load %arg1[%c0, %c0_0] : memref<128x42xf32, #tpu.memory_space<vmem>>, vector<128x42xf32>
    %1 = arith.truncf %0 : vector<128x42xf32> to vector<128x42xbf16>
    %c0_1 = arith.constant 0 : index
    %c0_2 = arith.constant 0 : index
    %2 = vector.load %arg2[%c0_1, %c0_2] : memref<42x64xbf16, #tpu.memory_space<vmem>>, vector<42x64xbf16>
    %cst = arith.constant dense<0.000000e+00> : vector<128x64xf32>
    %3 = tpu.matmul %1, %2, %cst {dimension_numbers = #tpu.dot_dimension_numbers<[1], [0], [0], [1], [0, 0, 1, 1], [], []>} : vector<128x42xbf16>, vector<42x64xbf16>, vector<128x64xf32> -> vector<128x64xf32>
    %c0_3 = arith.constant 0 : index
    %c0_4 = arith.constant 0 : index
    %4 = vector.load %arg5[%c0_3, %c0_4] : memref<1x64xf32, #tpu.memory_space<vmem>>, vector<1x64xf32>
    %5 = vector.broadcast %4 : vector<1x64xf32> to vector<128x64xf32>
    %6 = arith.addf %3, %5 : vector<128x64xf32>
    %cst_5 = arith.constant 2.000000e-01 : f32
    %7 = vector.broadcast %cst_5 : f32 to vector<128x64xf32>
    %8 = arith.mulf %7, %6 : vector<128x64xf32>
    %9 = arith.maximumf %6, %8 : vector<128x64xf32>
    %10 = arith.truncf %9 : vector<128x64xf32> to vector<128x64xbf16>
    %c0_6 = arith.constant 0 : index
    %c0_7 = arith.constant 0 : index
    %11 = vector.load %arg3[%c0_6, %c0_7] : memref<64x128xbf16, #tpu.memory_space<vmem>>, vector<64x128xbf16>
    %cst_8 = arith.constant dense<0.000000e+00> : vector<128x128xf32>
    %12 = tpu.matmul %10, %11, %cst_8 {dimension_numbers = #tpu.dot_dimension_numbers<[1], [0], [0], [1], [0, 0, 1, 1], [], []>} : vector<128x64xbf16>, vector<64x128xbf16>, vector<128x128xf32> -> vector<128x128xf32>
    %c0_9 = arith.constant 0 : index
    %c0_10 = arith.constant 0 : index
    %13 = vector.load %arg6[%c0_9, %c0_10] : memref<1x128xf32, #tpu.memory_space<vmem>>, vector<1x128xf32>
    %14 = vector.broadcast %13 : vector<1x128xf32> to vector<128x128xf32>
    %15 = arith.addf %12, %14 : vector<128x128xf32>
    %cst_11 = arith.constant 2.000000e-01 : f32
    %16 = vector.broadcast %cst_11 : f32 to vector<128x128xf32>
    %17 = arith.mulf %16, %15 : vector<128x128xf32>
    %18 = arith.maximumf %15, %17 : vector<128x128xf32>
    %19 = arith.truncf %18 : vector<128x128xf32> to vector<128x128xbf16>
    %c0_12 = arith.constant 0 : index
    %c0_13 = arith.constant 0 : index
    %20 = vector.load %arg4[%c0_12, %c0_13] : memref<128x256xbf16, #tpu.memory_space<vmem>>, vector<128x256xbf16>
    %cst_14 = arith.constant dense<0.000000e+00> : vector<128x256xf32>
    %21 = tpu.matmul %19, %20, %cst_14 {dimension_numbers = #tpu.dot_dimension_numbers<[1], [0], [0], [1], [0, 0, 1, 1], [], []>} : vector<128x128xbf16>, vector<128x256xbf16>, vector<128x256xf32> -> vector<128x256xf32>
    %c0_15 = arith.constant 0 : index
    %c0_16 = arith.constant 0 : index
    %22 = vector.load %arg7[%c0_15, %c0_16] : memref<1x256xf32, #tpu.memory_space<vmem>>, vector<1x256xf32>
    %23 = vector.broadcast %22 : vector<1x256xf32> to vector<128x256xf32>
    %24 = arith.addf %21, %23 : vector<128x256xf32>
    %cst_17 = arith.constant 2.000000e-01 : f32
    %25 = vector.broadcast %cst_17 : f32 to vector<128x256xf32>
    %26 = arith.mulf %25, %24 : vector<128x256xf32>
    %27 = arith.maximumf %24, %26 : vector<128x256xf32>
    %28 = arith.truncf %27 : vector<128x256xf32> to vector<128x256xbf16>
    %c0_18 = arith.constant 0 : index
    %c0_19 = arith.constant 0 : index
    %29 = vector.load %arg8[%c0_18, %c0_19] : memref<256x784xbf16, #tpu.memory_space<vmem>>, vector<256x784xbf16>
    %cst_20 = arith.constant dense<0.000000e+00> : vector<128x784xf32>
    %30 = tpu.matmul %28, %29, %cst_20 {dimension_numbers = #tpu.dot_dimension_numbers<[1], [0], [0], [1], [0, 0, 1, 1], [], []>} : vector<128x256xbf16>, vector<256x784xbf16>, vector<128x784xf32> -> vector<128x784xf32>
    %c0_21 = arith.constant 0 : index
    %c0_22 = arith.constant 0 : index
    %31 = vector.load %arg9[%c0_21, %c0_22] : memref<1x784xf32, #tpu.memory_space<vmem>>, vector<1x784xf32>
    %32 = vector.broadcast %31 : vector<1x784xf32> to vector<128x784xf32>
    %33 = arith.addf %30, %32 : vector<128x784xf32>
    %34 = math.tanh %33 : vector<128x784xf32>
    %c0_23 = arith.constant 0 : index
    %c0_24 = arith.constant 0 : index
    %35 = vector.load %arg10[%c0_23, %c0_24] : memref<128x784xf32, #tpu.memory_space<vmem>>, vector<128x784xf32>
    tpu.vector_store %arg10[%c0_23, %c0_24], %34 {strides = array<i32>} : memref<128x784xf32, #tpu.memory_space<vmem>>, vector<128x784xf32>,
    return
  }
  func.func @transform_0(%arg0: i32) -> (i32, i32) {
    %c0_i32 = arith.constant 0 : i32
    %c0_i32_0 = arith.constant 0 : i32
    return %arg0, %c0_i32 : i32, i32
  }
  func.func @transform_1(%arg0: i32) -> (i32, i32) {
    %c0_i32 = arith.constant 0 : i32
    %c0_i32_0 = arith.constant 0 : i32
    %c0_i32_1 = arith.constant 0 : i32
    return %c0_i32, %c0_i32_0 : i32, i32
  }
  func.func @transform_2(%arg0: i32) -> (i32, i32) {
    %c0_i32 = arith.constant 0 : i32
    %c0_i32_0 = arith.constant 0 : i32
    %c0_i32_1 = arith.constant 0 : i32
    return %c0_i32, %c0_i32_0 : i32, i32
  }
  func.func @transform_3(%arg0: i32) -> (i32, i32) {
    %c0_i32 = arith.constant 0 : i32
    %c0_i32_0 = arith.constant 0 : i32
    %c0_i32_1 = arith.constant 0 : i32
    return %c0_i32, %c0_i32_0 : i32, i32
  }
  func.func @transform_4(%arg0: i32) -> (i32, i32) {
    %c0_i32 = arith.constant 0 : i32
    %c0_i32_0 = arith.constant 0 : i32
    %c0_i32_1 = arith.constant 0 : i32
    return %c0_i32, %c0_i32_0 : i32, i32
  }
  func.func @transform_5(%arg0: i32) -> (i32, i32) {
    %c0_i32 = arith.constant 0 : i32
    %c0_i32_0 = arith.constant 0 : i32
    %c0_i32_1 = arith.constant 0 : i32
    return %c0_i32, %c0_i32_0 : i32, i32
  }
  func.func @transform_6(%arg0: i32) -> (i32, i32) {
    %c0_i32 = arith.constant 0 : i32
    %c0_i32_0 = arith.constant 0 : i32
    %c0_i32_1 = arith.constant 0 : i32
    return %c0_i32, %c0_i32_0 : i32, i32
  }
  func.func @transform_7(%arg0: i32) -> (i32, i32) {
    %c0_i32 = arith.constant 0 : i32
    %c0_i32_0 = arith.constant 0 : i32
    %c0_i32_1 = arith.constant 0 : i32
    return %c0_i32, %c0_i32_0 : i32, i32
  }
  func.func @transform_8(%arg0: i32) -> (i32, i32) {
    %c0_i32 = arith.constant 0 : i32
    %c0_i32_0 = arith.constant 0 : i32
    %c0_i32_1 = arith.constant 0 : i32
    return %c0_i32, %c0_i32_0 : i32, i32
  }
  func.func @transform_9(%arg0: i32) -> (i32, i32) {
    %c0_i32 = arith.constant 0 : i32
    %c0_i32_0 = arith.constant 0 : i32
    return %arg0, %c0_i32 : i32, i32
  }
}

</mosaic_0001>

<bundles_post_ra>
// kernel: tpu_custom_call.1
= control target key start
LH: loop header
LB: loop body
LE: loop exit
PB: predicated region body
PF: predicated region fallthrough
CT: control target
= control target key end

     0   :  { %s3638_s30 = smov 0   ;;  %s4983_s0 = inlined_call_operand.vmem [shape: f32[256,42], index: 0, kind: input, shape index: {}]   ;;  %s4984_s1 = inlined_call_operand.vmem [shape: bf16[42,64], index: 1, kind: input, shape index: {}]   ;;  %s4985_s2 = inlined_call_operand.vmem [shape: bf16[64,128], index: 2, kind: input, shape index: {}]   ;;  %s4986_s3 = inlined_call_operand.vmem [shape: bf16[128,256], index: 3, kind: input, shape index: {}]   ;;  %s4987_s4 = inlined_call_operand.vmem [shape: f32[1,64], index: 4, kind: input, shape index: {}]   ;;  %s4988_s5 = inlined_call_operand.vmem [shape: f32[1,128], index: 5, kind: input, shape index: {}]   ;;  %s4989_s6 = inlined_call_operand.vmem [shape: f32[1,256], index: 6, kind: input, shape index: {}]   ;;  %s4990_s7 = inlined_call_operand.vmem [shape: bf16[256,784], index: 7, kind: input, shape index: {}]   ;;  %s4991_s8 = inlined_call_operand.vmem [shape: f32[1,784], index: 8, kind: input, shape index: {}]   ;;  %s4992_s9 = inlined_call_operand.vmem [shape: f32[256,784], index: 9, kind: output, shape index: {}]  }
   0x1 LB: > { %s2627_s10 = sadd.s32 4294967295, %s3586_s30   ;;  %p2631_p0 = scmp.ge.s32.totalorder %s3586_s30, 1  ;;  %s3586_s30 = sphi %s3638_s30, %s19_s30  }
   0x2   : > { %p288_p1 = scmp.lt.s32.totalorder %s3586_s30, 3 }
   0x4   : > { %p289_p2 = pnand %p2631_p0, %p288_p1 }
   0x5   : > { %s2632_s15 = sshll.u32 (!%p289_p2), %s2627_s10, 4 }
   0x6   : > { %292 = sbr.rel (%p289_p2) target bundleno = 1100 (0x44c), region = 56  ;;  %p326_p3 = scmp.lt.s32.totalorder (!%p289_p2), %s2632_s15, 31 }
   0xb   : > { %v2646_v0 = vld [vmem:[%s4984_s1 + $0x10] sm:$0xf]  ;;  %v3196_v1 = vld [vmem:[%s4984_s1 + $0x10] sm:$0x10]  ;;  %vm415_vm0 = vcmask 1044480   ;;  %v3195_v4 = vld [vmem:[%s4984_s1 + $0x8] sm:$0xff] }
   0xc   : > { %v2647_v2 = vor.u32 %v3196_v1, %v2646_v0  ;;  %s4994_s15 = smov (!%p326_p3, %s2632_s15), 31  ;;  %v3194_v5 = vld [vmem:[%s4984_s1] sm:$0xff]  ;;  %vm390_vm1 = vcmask 343040   ;;  %v3200_v30 = vld [vmem:[%s4985_s2 + $0x18] sm:$0xff]  ;;  %v3199_v31 = vld [vmem:[%s4985_s2 + $0x10] sm:$0xff]  ;;  %vm544_vm2 = vcmask 523264  }
   0xd   : > { %s2633_s18 = sshll.u32 %s4994_s15, 3  ;;  %573 = vmatpush.bf16.msra.mxu1 %v3200_v30  ;;  %3332 = vmatpush.bf16.msra.mxu2 %v3200_v30  ;;  %v3198_v32 = vld [vmem:[%s4985_s2 + $0x8] sm:$0xff]  ;;  %v3197_v33 = vld [vmem:[%s4985_s2] sm:$0xff]  ;;  %s3344_s10 = smul.u32 56, %s4994_s15  ;;  %vm2462_vm3 = vcmask 130048  }
   0xe   : > { %v417_v3 = vsel %vm415_vm0, %v2647_v2, 0  ;;  %s3661_s21 = scalar_lea.vmem %s4983_s0, %s2633_s18  ;;  %v3705_v35 = vld [vmem:[%s4987_s4] ss:$0 sm:$0xff]  ;;  %v2732_v30 = vld [vmem:[%s4986_s3 + $0x68] sm:$0xf0] }
   0xf   : > { %424 = vmatpush.bf16.msra.mxu0 %v417_v3  ;;  %3329 = vmatpush.bf16.msra.mxu3 %v417_v3  ;;  %v339_v6 = vld [vmem:[%s3661_s21] sm:$0xff]  ;;  %v340_v7 = vld [vmem:[%s3661_s21 + $0x8] sm:$0xff]  ;;  %v341_v9 = vld [vmem:[%s3661_s21 + $0x10] sm:$0xff]  ;;  %s4374_s13 = scalar_lea.vmem %s4992_s9, %s3344_s10 }
  0x10   : > { %v355_v8 = vpack.c.bf16 %v340_v7, %v339_v6  ;;  %v342_v10 = vld [vmem:[%s3661_s21 + $0x18] sm:$0xff]  ;;  %v349_v12 = vld [vmem:[%s3661_s21 + $0x50] sm:$0xff]  ;;  %v343_v15 = vld [vmem:[%s3661_s21 + $0x20] sm:$0xff] }
  0x11   : > { %v356_v11 = vpack.c.bf16 %v342_v10, %v341_v9  ;;  %v350_v13 = vld [vmem:[%s3661_s21 + $0x58] sm:$0xff]  ;;  %v344_v16 = vld [vmem:[%s3661_s21 + $0x28] sm:$0xff]  ;;  %v351_v18 = vld [vmem:[%s3661_s21 + $0x60] sm:$0xff]  ;;  %574 = vmatpush.bf16.msra.mxu1 %v3199_v31  ;;  %3333 = vmatpush.bf16.msra.mxu2 %v3199_v31 }
  0x12   : > { %v360_v14 = vpack.c.bf16 %v350_v13, %v349_v12  ;;  %v357_v17 = vpack.c.bf16 %v344_v16, %v343_v15  ;;  %v352_v19 = vld [vmem:[%s3661_s21 + $0x68] sm:$0xff]  ;;  %v345_v21 = vld [vmem:[%s3661_s21 + $0x30] sm:$0xff]  ;;  %v346_v22 = vld [vmem:[%s3661_s21 + $0x38] sm:$0xff] }
  0x13   : > { %425 = vmatpush.bf16.msra.mxu0 %v3195_v4  ;;  %3330 = vmatpush.bf16.msra.mxu3 %v3195_v4  ;;  %v361_v20 = vpack.c.bf16 %v352_v19, %v351_v18  ;;  %v353_v23 = vld [vmem:[%s3661_s21 + $0x70] sm:$0xff]  ;;  %v354_v24 = vld [vmem:[%s3661_s21 + $0x78] sm:$0xff]  ;;  %v358_v25 = vpack.c.bf16 %v346_v22, %v345_v21  ;;  %v347_v27 = vld [vmem:[%s3661_s21 + $0x40] sm:$0xff] }
  0x14   : > { %v362_v26 = vpack.c.bf16 %v354_v24, %v353_v23  ;;  %v348_v28 = vld [vmem:[%s3661_s21 + $0x48] sm:$0xff]  ;;  %v2738_v15 = vld [vmem:[%s4986_s3 + $0x70] sm:$0xf]  ;;  %v3216_v16 = vld [vmem:[%s4986_s3 + $0x74] sm:$0xf0] }
  0x15   : > { %v359_v29 = vpack.c.bf16 %v348_v28, %v347_v27  ;;  %575 = vmatpush.bf16.msra.mxu1 %v3198_v32  ;;  %3334 = vmatpush.bf16.msra.mxu2 %v3198_v32  ;;  %v2730_v18 = vld [vmem:[%s4986_s3 + $0x60] sm:$0xf]  ;;  %v3214_v19 = vld [vmem:[%s4986_s3 + $0x64] sm:$0xf0]  ;;  %v3215_v21 = vld [vmem:[%s4986_s3 + $0x74] sm:$0xf] }
  0x16   : > { %v2731_v22 = vor.u32 %v3214_v19, %v2730_v18  ;;  %v2722_v23 = vld [vmem:[%s4986_s3 + $0x50] sm:$0xf]  ;;  %v2740_v24 = vld [vmem:[%s4986_s3 + $0x78] sm:$0xf0]  ;;  %v3212_v27 = vld [vmem:[%s4986_s3 + $0x54] sm:$0xf0] }
  0x17   : > { %426 = vmatpush.bf16.msra.mxu0 %v3194_v5  ;;  %3331 = vmatpush.bf16.msra.mxu3 %v3194_v5  ;;  %v2743_v28 = vor.u32 %v3215_v21, %v2740_v24  ;;  %v3203_v18 = vld [vmem:[%s4986_s3 + $0x14] sm:$0xf]  ;;  %v2692_v19 = vld [vmem:[%s4986_s3 + $0x18] sm:$0xf0]  ;;  %v2682_v21 = vld [vmem:[%s4986_s3] sm:$0xf] }
  0x19   : > { %576 = vmatpush.bf16.msra.mxu1 %v3197_v33  ;;  %3335 = vmatpush.bf16.msra.mxu2 %v3197_v33 }
  0x1a   : > { %2648 = vmatmul.msk.bf16.vlgmr.msra.gmra.mxu0 %vm390_vm1, %v355_v8  ;;  %2653 = vmatmul.msk.bf16.vlgmr.msra.gmra.mxu3 %vm390_vm1, %v360_v14 }
  0x1b   : > { %809 = vmatpush.bf16.msrb.mxu3 %v2743_v28  ;;  %v3830_v28 = vld [vmem:[%s4988_s5] ss:$0 sm:$0xff] }
  0x2a   : > { %2649 = vmatmul.msk.bf16.gmra.mxu0 %vm390_vm1, %v356_v11  ;;  %2654 = vmatmul.msk.bf16.gmra.mxu3 %vm390_vm1, %v361_v20 }
  0x3a   : > { %2650 = vmatmul.msk.bf16.gmra.mxu0 %vm390_vm1, %v357_v17  ;;  %2655 = vmatmul.msk.bf16.gmra.mxu3 %vm390_vm1, %v362_v26  ;;  %v2739_v17 = vor.u32 %v3216_v16, %v2738_v15  ;;  %v2690_v15 = vld [vmem:[%s4986_s3 + $0x10] sm:$0xf]  ;;  %v3204_v16 = vld [vmem:[%s4986_s3 + $0x14] sm:$0xf0] }
  0x3c   : > { %760 = vmatpush.bf16.msrb.mxu2 %v2739_v17  ;;  %v2691_v17 = vor.u32 %v3204_v16, %v2690_v15 }
  0x40   : > { %761 = vmatpush.bf16.msrb.mxu2 %v2731_v22  ;;  %v3202_v22 = vld [vmem:[%s4986_s3 + $0x4] sm:$0xf0] }
  0x41   : > { %v2683_v24 = vor.u32 %v3202_v22, %v2682_v21 }
  0x4a   : > { %2651 = vmatmul.msk.bf16.gmra.mxu0 %vm390_vm1, %v358_v25 }
  0x5a   : > { %2652 = vmatmul.msk.bf16.gmra.mxu0 %vm390_vm1, %v359_v29  ;;  %v3213_v29 = vld [vmem:[%s4986_s3 + $0x64] sm:$0xf] }
  0x5b   : > { %v2735_v32 = vor.u32 %v3213_v29, %v2732_v30 }
  0x5d   : > { %810 = vmatpush.bf16.msrb.mxu3 %v2735_v32 }
  0x97   : > { %v428_v34 = vpop.f32.mrf.mxu0 }
  0x98   : > { %v429_v36 = vadd.f32 %v3705_v35, %v428_v34  ;;  %v2723_v34 = vor.u32 %v3212_v27, %v2722_v23  ;;  %v3201_v23 = vld [vmem:[%s4986_s3 + $0x4] sm:$0xf] }
  0x9a   : > { %v468_v38 = vmul.f32 0.2, %v429_v36  ;;  %762 = vmatpush.bf16.msrb.mxu2 %v2723_v34 }
  0x9c   : > { %v484_v41 = vmax.f32 %v429_v36, %v468_v38  ;;  %v3211_v36 = vld [vmem:[%s4986_s3 + $0x54] sm:$0xf] }
  0x9d   : > { %v453_v46 = vpop.f32.mrf.mxu3 }
  0x9e   : > { %v454_v50 = vadd.f32 %v3705_v35, %v453_v46  ;;  %v3209_v46 = vld [vmem:[%s4986_s3 + $0x44] sm:$0xf] }
  0x9f   : > { %v430_v37 = vpop.f32.mrf.mxu0 }
  0xa0   : > { %v431_v39 = vadd.f32 %v3705_v35, %v430_v37  ;;  %v478_v54 = vmul.f32 0.2, %v454_v50  ;;  %v2724_v37 = vld [vmem:[%s4986_s3 + $0x58] sm:$0xf0] }
  0xa2   : > { %v469_v40 = vmul.f32 0.2, %v431_v39  ;;  %v494_v59 = vmax.f32 %v454_v50, %v478_v54 }
  0xa4   : > { %v485_v42 = vmax.f32 %v431_v39, %v469_v40 }
  0xa5   : > { %v455_v55 = vpop.f32.mrf.mxu3 }
  0xa6   : > { %v500_v43 = vpack.c.bf16 %v485_v42, %v484_v41  ;;  %v456_v57 = vadd.f32 %v3705_v35, %v455_v55  ;;  %v2714_v41 = vld [vmem:[%s4986_s3 + $0x40] sm:$0xf]  ;;  %v3210_v42 = vld [vmem:[%s4986_s3 + $0x44] sm:$0xf0] }
  0xa7   : > { %v433_v44 = vpop.f32.mrf.mxu0 }
  0xa8   : > { %2672 = vmatmul.msk.bf16.vlgmr.msra.gmra.mxu1 %vm544_vm2, %v500_v43  ;;  %v434_v45 = vadd.f32 %v3705_v35, %v433_v44  ;;  %v479_v60 = vmul.f32 0.2, %v456_v57  ;;  %v2727_v44 = vor.u32 %v3211_v36, %v2724_v37 }
  0xaa   : > { %v470_v48 = vmul.f32 0.2, %v434_v45  ;;  %v495_v61 = vmax.f32 %v456_v57, %v479_v60  ;;  %811 = vmatpush.bf16.msrb.mxu3 %v2727_v44 }
  0xac   : > { %v486_v52 = vmax.f32 %v434_v45, %v470_v48  ;;  %v505_v63 = vpack.c.bf16 %v495_v61, %v494_v59  ;;  %v2715_v45 = vor.u32 %v3210_v42, %v2714_v41  ;;  %v2698_v61 = vld [vmem:[%s4986_s3 + $0x20] sm:$0xf] }
  0xad   : > { %v458_v0 = vpop.f32.mrf.mxu3 }
  0xae   : > { %2677 = vmatmul.msk.bf16.vlgmr.msra.gmra.mxu2 %vm544_vm2, %v505_v63  ;;  %v459_v4 = vadd.f32 %v3705_v35, %v458_v0 }
  0xaf   : > { %v435_v47 = vpop.f32.mrf.mxu0  ;;  %763 = vmatpush.bf16.msrb.mxu2 %v2715_v45 }
  0xb0   : > { %v436_v49 = vadd.f32 %v3705_v35, %v435_v47  ;;  %v480_v8 = vmul.f32 0.2, %v459_v4  ;;  %v2716_v47 = vld [vmem:[%s4986_s3 + $0x48] sm:$0xf0] }
  0xb2   : > { %v471_v51 = vmul.f32 0.2, %v436_v49  ;;  %v496_v13 = vmax.f32 %v459_v4, %v480_v8 }
  0xb4   : > { %v487_v53 = vmax.f32 %v436_v49, %v471_v51  ;;  %v2706_v51 = vld [vmem:[%s4986_s3 + $0x30] sm:$0xf] }
  0xb5   : > { %v460_v9 = vpop.f32.mrf.mxu3 }
  0xb6   : > { %v501_v56 = vpack.c.bf16 %v487_v53, %v486_v52  ;;  %v461_v11 = vadd.f32 %v3705_v35, %v460_v9  ;;  %v3208_v52 = vld [vmem:[%s4986_s3 + $0x34] sm:$0xf0] }
  0xb7   : > { %v438_v58 = vpop.f32.mrf.mxu0 }
  0xb8   : > { %2673 = vmatmul.msk.bf16.gmra.mxu1 %vm544_vm2, %v501_v56  ;;  %v439_v62 = vadd.f32 %v3705_v35, %v438_v58  ;;  %v481_v14 = vmul.f32 0.2, %v461_v11  ;;  %v2719_v56 = vor.u32 %v3209_v46, %v2716_v47  ;;  %v2707_v58 = vor.u32 %v3208_v52, %v2706_v51 }
  0xba   : > { %v472_v2 = vmul.f32 0.2, %v439_v62  ;;  %v497_v20 = vmax.f32 %v461_v11, %v481_v14  ;;  %812 = vmatpush.bf16.msrb.mxu3 %v2719_v56  ;;  %764 = vmatpush.bf16.msrb.mxu2 %v2707_v58  ;;  %v2708_v11 = vld [vmem:[%s4986_s3 + $0x38] sm:$0xf0]  ;;  %v3269_v58 = vld [vmem:[%s4990_s7 + $0x1a0] sm:$0xf0] }
  0xbc   : > { %v488_v6 = vmax.f32 %v439_v62, %v472_v2  ;;  %v506_v26 = vpack.c.bf16 %v497_v20, %v496_v13  ;;  %v3206_v62 = vld [vmem:[%s4986_s3 + $0x24] sm:$0xf0]  ;;  %v2700_v13 = vld [vmem:[%s4986_s3 + $0x28] sm:$0xf0]  ;;  %v2695_v20 = vor.u32 %v3203_v18, %v2692_v19 }
  0xbd   : > { %v463_v31 = vpop.f32.mrf.mxu3  ;;  %v2699_v0 = vor.u32 %v3206_v62, %v2698_v61  ;;  %v3262_v61 = vld [vmem:[%s4990_s7 + $0x168] sm:$0xf0] }
  0xbe   : > { %2678 = vmatmul.msk.bf16.gmra.mxu2 %vm544_vm2, %v506_v26  ;;  %v464_v40 = vadd.f32 %v3705_v35, %v463_v31 }
  0xbf   : > { %v440_v1 = vpop.f32.mrf.mxu0  ;;  %765 = vmatpush.bf16.msrb.mxu2 %v2699_v0 }
  0xc0   : > { %v441_v3 = vadd.f32 %v3705_v35, %v440_v1  ;;  %v482_v50 = vmul.f32 0.2, %v464_v40 }
  0xc2   : > { %v473_v5 = vmul.f32 0.2, %v441_v3  ;;  %v498_v59 = vmax.f32 %v464_v40, %v482_v50 }
  0xc3   : > { %766 = vmatpush.bf16.msrb.mxu2 %v2691_v17 }
  0xc4   : > { %v489_v7 = vmax.f32 %v441_v3, %v473_v5 }
  0xc5   : > { %v465_v53 = vpop.f32.mrf.mxu3 }
  0xc6   : > { %v502_v10 = vpack.c.bf16 %v489_v7, %v488_v6  ;;  %v466_v55 = vadd.f32 %v3705_v35, %v465_v53 }
  0xc7   : > { %v443_v12 = vpop.f32.mrf.mxu0  ;;  %767 = vmatpush.bf16.msrb.mxu2 %v2683_v24  ;;  %v3138_v24 = vld [vmem:[%s4990_s7 + $0x310] sm:$0xf] }
  0xc8   : > { %2674 = vmatmul.msk.bf16.gmra.mxu1 %vm544_vm2, %v502_v10  ;;  %v444_v25 = vadd.f32 %v3705_v35, %v443_v12  ;;  %v483_v60 = vmul.f32 0.2, %v466_v55  ;;  %v3207_v10 = vld [vmem:[%s4986_s3 + $0x34] sm:$0xf] }
  0xc9   : > { %v2711_v12 = vor.u32 %v3207_v10, %v2708_v11  ;;  %v3325_v10 = vld [vmem:[%s4990_s7 + $0x360] sm:$0xf0]  ;;  %v2886_v11 = vld [vmem:[%s4990_s7 + $0x118] sm:$0xf] }
  0xca   : > { %v474_v38 = vmul.f32 0.2, %v444_v25  ;;  %v499_v63 = vmax.f32 %v466_v55, %v483_v60 }
  0xcb   : > { %813 = vmatpush.bf16.msrb.mxu3 %v2711_v12 }
  0xcc   : > { %v490_v48 = vmax.f32 %v444_v25, %v474_v38  ;;  %v507_v2 = vpack.c.bf16 %v499_v63, %v498_v59  ;;  %v2684_v25 = vld [vmem:[%s4986_s3 + $0x8] sm:$0xf0]  ;;  %v2914_v59 = vld [vmem:[%s4990_s7 + $0x150] sm:$0xf] }
  0xcd   : > { %v2687_v26 = vor.u32 %v3201_v23, %v2684_v25  ;;  %v2915_v62 = vor.u32 %v3262_v61, %v2914_v59  ;;  %v3318_v25 = vld [vmem:[%s4990_s7 + $0x328] sm:$0xf0] }
  0xce   : > { %2679 = vmatmul.msk.bf16.gmra.mxu2 %vm544_vm2, %v507_v2  ;;  %v3234_v59 = vld [vmem:[%s4990_s7 + $0x88] sm:$0xf0] }
  0xcf   : > { %v445_v33 = vpop.f32.mrf.mxu0 }
  0xd0   : > { %v446_v39 = vadd.f32 %v3705_v35, %v445_v33 }
  0xd2   : > { %v475_v43 = vmul.f32 0.2, %v446_v39 }
  0xd4   : > { %v491_v49 = vmax.f32 %v446_v39, %v475_v43 }
  0xd6   : > { %v503_v54 = vpack.c.bf16 %v491_v49, %v490_v48 }
  0xd7   : > { %v448_v57 = vpop.f32.mrf.mxu0 }
  0xd8   : > { %2675 = vmatmul.msk.bf16.gmra.mxu1 %vm544_vm2, %v503_v54  ;;  %v449_v1 = vadd.f32 %v3705_v35, %v448_v57  ;;  %v2942_v57 = vld [vmem:[%s4990_s7 + $0x188] sm:$0xf] }
  0xd9   : > { %v2943_v60 = vor.u32 %v3269_v58, %v2942_v57  ;;  %v2802_v58 = vld [vmem:[%s4990_s7 + $0x70] sm:$0xf] }
  0xda   : > { %v476_v4 = vmul.f32 0.2, %v449_v1  ;;  %v2803_v61 = vor.u32 %v3234_v59, %v2802_v58 }
  0xdb   : > { %1658 = vmatpush.bf16.msrb.mxu0 %v2943_v60  ;;  %v3259_v60 = vld [vmem:[%s4990_s7 + $0x154] sm:$0xf] }
  0xdc   : > { %v492_v7 = vmax.f32 %v449_v1, %v476_v4 }
  0xdf   : > { %v450_v3 = vpop.f32.mrf.mxu0  ;;  %1659 = vmatpush.bf16.msrb.mxu0 %v2915_v62  ;;  %v2916_v62 = vld [vmem:[%s4990_s7 + $0x16c] sm:$0xf0] }
  0xe0   : > { %v451_v5 = vadd.f32 %v3705_v35, %v450_v3  ;;  %v3205_v35 = vld [vmem:[%s4986_s3 + $0x24] sm:$0xf] }
  0xe1   : > { %v2703_v14 = vor.u32 %v3205_v35, %v2700_v13  ;;  %v3255_v35 = vld [vmem:[%s4990_s7 + $0x130] sm:$0xf0] }
  0xe2   : > { %v477_v6 = vmul.f32 0.2, %v451_v5  ;;  %v2887_v13 = vor.u32 %v3255_v35, %v2886_v11  ;;  %v3227_v35 = vld [vmem:[%s4990_s7 + $0x50] sm:$0xf0] }
  0xe3   : > { %814 = vmatpush.bf16.msrb.mxu3 %v2703_v14 }
  0xe4   : > { %v493_v8 = vmax.f32 %v451_v5, %v477_v6  ;;  %1660 = vmatpush.bf16.msrb.mxu0 %v2887_v13 }
  0xe6   : > { %v504_v9 = vpack.c.bf16 %v493_v8, %v492_v7 }
  0xe7   : > { %815 = vmatpush.bf16.msrb.mxu3 %v2695_v20 }
  0xe8   : > { %2676 = vmatmul.msk.bf16.gmra.mxu1 %vm544_vm2, %v504_v9  ;;  %v3166_v9 = vld [vmem:[%s4990_s7 + $0x348] sm:$0xf] }
  0xe9   : > { %v3167_v12 = vor.u32 %v3325_v10, %v3166_v9  ;;  %v3297_v9 = vld [vmem:[%s4990_s7 + $0x280] sm:$0xf0] }
  0xeb   : > { %816 = vmatpush.bf16.msrb.mxu3 %v2687_v26  ;;  %1707 = vmatpush.bf16.msrb.mxu1 %v3167_v12  ;;  %v2858_v26 = vld [vmem:[%s4990_s7 + $0xe0] sm:$0xf]  ;;  %v2774_v12 = vld [vmem:[%s4990_s7 + $0x38] sm:$0xf] }
  0xec   : > { %v2775_v13 = vor.u32 %v3227_v35, %v2774_v12 }
 0x125   : > { %v578_v27 = vpop.f32.mrf.mxu1 }
 0x126   : > { %v579_v29 = vadd.f32 %v3830_v28, %v578_v27  ;;  %v3139_v27 = vor.u32 %v3318_v25, %v3138_v24 }
 0x128   : > { %v618_v31 = vmul.f32 0.2, %v579_v29  ;;  %1708 = vmatpush.bf16.msrb.mxu1 %v3139_v27 }
 0x12a   : > { %v634_v34 = vmax.f32 %v579_v29, %v618_v31  ;;  %v3248_v29 = vld [vmem:[%s4990_s7 + $0xf8] sm:$0xf0]  ;;  %v3311_v31 = vld [vmem:[%s4990_s7 + $0x2f0] sm:$0xf0] }
 0x12d   : > { %v580_v30 = vpop.f32.mrf.mxu1 }
 0x12e   : > { %v581_v32 = vadd.f32 %v3830_v28, %v580_v30  ;;  %v3110_v30 = vld [vmem:[%s4990_s7 + $0x2d8] sm:$0xf] }
 0x130   : > { %v619_v33 = vmul.f32 0.2, %v581_v32 }
 0x131   : > { %v603_v5 = vpop.f32.mrf.mxu2 }
 0x132   : > { %v635_v36 = vmax.f32 %v581_v32, %v619_v33  ;;  %v604_v32 = vadd.f32 %v3830_v28, %v603_v5  ;;  %v2888_v5 = vld [vmem:[%s4990_s7 + $0x134] sm:$0xf0] }
 0x134   : > { %v650_v37 = vpack.c.bf16 %v635_v36, %v634_v34  ;;  %v2859_v34 = vor.u32 %v3248_v29, %v2858_v26  ;;  %v2830_v36 = vld [vmem:[%s4990_s7 + $0xa8] sm:$0xf]  ;;  %v3238_v29 = vld [vmem:[%s4990_s7 + $0xac] sm:$0xf] }
 0x135   : > { %v583_v38 = vpop.f32.mrf.mxu1 }
 0x136   : > { %768 = vmatmul.bf16.vlgmr.msrb.gmra.mxu2 %v650_v37  ;;  %817 = vmatmul.bf16.vlgmr.msrb.gmra.mxu3 %v650_v37  ;;  %v584_v39 = vadd.f32 %v3830_v28, %v583_v38  ;;  %v3241_v37 = vld [vmem:[%s4990_s7 + $0xc0] sm:$0xf0]  ;;  %v3111_v38 = vor.u32 %v3311_v31, %v3110_v30  ;;  %v2832_v30 = vld [vmem:[%s4990_s7 + $0xc4] sm:$0xf0] }
 0x137   : > { %1661 = vmatpush.bf16.msrb.mxu0 %v2859_v34  ;;  %v2835_v31 = vor.u32 %v3238_v29, %v2832_v30 }
 0x138   : > { %v620_v41 = vmul.f32 0.2, %v584_v39  ;;  %1709 = vmatpush.bf16.msrb.mxu1 %v3111_v38  ;;  %v3290_v38 = vld [vmem:[%s4990_s7 + $0x248] sm:$0xf0] }
 0x139   : > { %v605_v15 = vpop.f32.mrf.mxu2 }
 0x13a   : > { %v636_v44 = vmax.f32 %v584_v39, %v620_v41  ;;  %v606_v33 = vadd.f32 %v3830_v28, %v605_v15  ;;  %v2831_v39 = vor.u32 %v3241_v37, %v2830_v36  ;;  %v3026_v37 = vld [vmem:[%s4990_s7 + $0x230] sm:$0xf] }
 0x13c   : > { %v629_v41 = vmul.f32 0.2, %v606_v33  ;;  %1662 = vmatpush.bf16.msrb.mxu0 %v2831_v39  ;;  %v3231_v39 = vld [vmem:[%s4990_s7 + $0x74] sm:$0xf] }
 0x13d   : > { %v585_v40 = vpop.f32.mrf.mxu1 }
 0x13e   : > { %v586_v42 = vadd.f32 %v3830_v28, %v585_v40  ;;  %v628_v40 = vmul.f32 0.2, %v604_v32 }
 0x140   : > { %v621_v43 = vmul.f32 0.2, %v586_v42  ;;  %1663 = vmatpush.bf16.msrb.mxu0 %v2803_v61  ;;  %v2970_v61 = vld [vmem:[%s4990_s7 + $0x1c0] sm:$0xf] }
 0x141   : > { %v608_v23 = vpop.f32.mrf.mxu2 }
 0x142   : > { %v637_v45 = vmax.f32 %v586_v42, %v621_v43  ;;  %v644_v42 = vmax.f32 %v604_v32, %v628_v40  ;;  %v3294_v32 = vld [vmem:[%s4990_s7 + $0x26c] sm:$0xf]  ;;  %v3027_v40 = vor.u32 %v3290_v38, %v3026_v37 }
 0x144   : > { %v651_v46 = vpack.c.bf16 %v637_v45, %v636_v44  ;;  %v645_v44 = vmax.f32 %v606_v33, %v629_v41  ;;  %v609_v45 = vadd.f32 %v3830_v28, %v608_v23  ;;  %1664 = vmatpush.bf16.msrb.mxu0 %v2775_v13  ;;  %v3056_v33 = vld [vmem:[%s4990_s7 + $0x284] sm:$0xf0]  ;;  %v2804_v41 = vld [vmem:[%s4990_s7 + $0x8c] sm:$0xf0] }
 0x145   : > { %v588_v47 = vpop.f32.mrf.mxu1 }
 0x146   : > { %773 = vmatmul.bf16.gmra.mxu2 %v651_v46  ;;  %822 = vmatmul.bf16.gmra.mxu3 %v651_v46  ;;  %v589_v48 = vadd.f32 %v3830_v28, %v588_v47  ;;  %v655_v46 = vpack.c.bf16 %v645_v44, %v644_v42  ;;  %v630_v47 = vmul.f32 0.2, %v609_v45  ;;  %v3287_v42 = vld [vmem:[%s4990_s7 + $0x234] sm:$0xf]  ;;  %v2807_v44 = vor.u32 %v3231_v39, %v2804_v41  ;;  %v3256_v41 = vld [vmem:[%s4990_s7 + $0x138] sm:$0xf0] }
 0x148   : > { %v622_v50 = vmul.f32 0.2, %v589_v48 }
 0x149   : > { %v610_v43 = vpop.f32.mrf.mxu2 }
 0x14a   : > { %v638_v53 = vmax.f32 %v589_v48, %v622_v50  ;;  %v3082_v48 = vld [vmem:[%s4990_s7 + $0x2a0] sm:$0xf]  ;;  %v3266_v50 = vld [vmem:[%s4990_s7 + $0x18c] sm:$0xf] }
 0x14d   : > { %v590_v49 = vpop.f32.mrf.mxu1 }
 0x14e   : > { %v591_v51 = vadd.f32 %v3830_v28, %v590_v49  ;;  %v3304_v49 = vld [vmem:[%s4990_s7 + $0x2b8] sm:$0xf0] }
 0x150   : > { %v623_v52 = vmul.f32 0.2, %v591_v51 }
 0x152   : > { %v639_v54 = vmax.f32 %v591_v51, %v623_v52  ;;  %v3083_v51 = vor.u32 %v3304_v49, %v3082_v48  ;;  %v2944_v52 = vld [vmem:[%s4990_s7 + $0x1a4] sm:$0xf0] }
 0x154   : > { %v652_v55 = vpack.c.bf16 %v639_v54, %v638_v53  ;;  %v3322_v53 = vld [vmem:[%s4990_s7 + $0x34c] sm:$0xf]  ;;  %v3168_v54 = vld [vmem:[%s4990_s7 + $0x364] sm:$0xf0]  ;;  %1710 = vmatpush.bf16.msrb.mxu1 %v3083_v51  ;;  %v2998_v51 = vld [vmem:[%s4990_s7 + $0x1f8] sm:$0xf] }
 0x155   : > { %v593_v56 = vpop.f32.mrf.mxu1  ;;  %v3171_v57 = vor.u32 %v3322_v53, %v3168_v54  ;;  %v3224_v53 = vld [vmem:[%s4990_s7 + $0x3c] sm:$0xf] }
 0x156   : > { %778 = vmatmul.bf16.gmra.mxu2 %v652_v55  ;;  %827 = vmatmul.bf16.gmra.mxu3 %v652_v55  ;;  %v594_v63 = vadd.f32 %v3830_v28, %v593_v56  ;;  %v611_v55 = vadd.f32 %v3830_v28, %v610_v43  ;;  %v2947_v56 = vor.u32 %v3266_v50, %v2944_v52  ;;  %v3028_v43 = vld [vmem:[%s4990_s7 + $0x24c] sm:$0xf0]  ;;  %v3283_v52 = vld [vmem:[%s4990_s7 + $0x210] sm:$0xf0] }
 0x157   : > { %1805 = vmatpush.bf16.msra.mxu3 %v3171_v57  ;;  %v2999_v54 = vor.u32 %v3283_v52, %v2998_v51  ;;  %v3000_v57 = vld [vmem:[%s4990_s7 + $0x214] sm:$0xf0] }
 0x158   : > { %v624_v1 = vmul.f32 0.2, %v594_v63  ;;  %1756 = vmatpush.bf16.msra.mxu2 %v2947_v56  ;;  %v631_v10 = vmul.f32 0.2, %v611_v55  ;;  %v3280_v56 = vld [vmem:[%s4990_s7 + $0x1fc] sm:$0xf] }
 0x159   : > { %v3003_v59 = vor.u32 %v3280_v56, %v3000_v57 }
 0x15a   : > { %v640_v4 = vmax.f32 %v594_v63, %v624_v1  ;;  %v3315_v63 = vld [vmem:[%s4990_s7 + $0x314] sm:$0xf]  ;;  %v613_v1 = vpop.f32.mrf.mxu2 }
 0x15b   : > { %v614_v26 = vadd.f32 %v3830_v28, %v613_v1  ;;  %v2748_v1 = vld [vmem:[%s4990_s7 + $0x1c] sm:$0xf0] }
 0x15d   : > { %v595_v0 = vpop.f32.mrf.mxu1  ;;  %v632_v34 = vmul.f32 0.2, %v614_v26 }
 0x15e   : > { %v596_v2 = vadd.f32 %v3830_v28, %v595_v0  ;;  %v3140_v0 = vld [vmem:[%s4990_s7 + $0x32c] sm:$0xf0] }
 0x15f   : > { %v648_v49 = vmax.f32 %v614_v26, %v632_v34 }
 0x160   : > { %v625_v3 = vmul.f32 0.2, %v596_v2 }
 0x162   : > { %v641_v6 = vmax.f32 %v596_v2, %v625_v3  ;;  %v2919_v2 = vor.u32 %v3259_v60, %v2916_v62  ;;  %v3143_v3 = vor.u32 %v3315_v63, %v3140_v0  ;;  %v615_v24 = vpop.f32.mrf.mxu2  ;;  %v3276_v62 = vld [vmem:[%s4990_s7 + $0x1d8] sm:$0xf0]  ;;  %v3217_v63 = vld [vmem:[%s4990_s7 + $0x4] sm:$0xf] }
 0x163   : > { %v616_v27 = vadd.f32 %v3830_v28, %v615_v24  ;;  %v2971_v0 = vor.u32 %v3276_v62, %v2970_v61 }
 0x164   : > { %v653_v7 = vpack.c.bf16 %v641_v6, %v640_v4  ;;  %v3252_v4 = vld [vmem:[%s4990_s7 + $0x11c] sm:$0xf]  ;;  %1757 = vmatpush.bf16.msra.mxu2 %v2919_v2  ;;  %1806 = vmatpush.bf16.msra.mxu3 %v3143_v3  ;;  %v3273_v2 = vld [vmem:[%s4990_s7 + $0x1c4] sm:$0xf]  ;;  %v2972_v3 = vld [vmem:[%s4990_s7 + $0x1dc] sm:$0xf0] }
 0x165   : > { %v598_v8 = vpop.f32.mrf.mxu1  ;;  %v3308_v6 = vld [vmem:[%s4990_s7 + $0x2dc] sm:$0xf]  ;;  %v633_v36 = vmul.f32 0.2, %v616_v27 }
 0x166   : > { %783 = vmatmul.bf16.gmra.mxu2 %v653_v7  ;;  %832 = vmatmul.bf16.gmra.mxu3 %v653_v7  ;;  %v599_v14 = vadd.f32 %v3830_v28, %v598_v8  ;;  %v3112_v7 = vld [vmem:[%s4990_s7 + $0x2f4] sm:$0xf0]  ;;  %v3054_v8 = vld [vmem:[%s4990_s7 + $0x268] sm:$0xf] }
 0x167   : > { %v3055_v11 = vor.u32 %v3297_v9, %v3054_v8  ;;  %v3115_v15 = vor.u32 %v3308_v6, %v3112_v7  ;;  %v649_v50 = vmax.f32 %v616_v27, %v633_v36  ;;  %v2950_v6 = vld [vmem:[%s4990_s7 + $0x190] sm:$0xf]  ;;  %v3270_v7 = vld [vmem:[%s4990_s7 + $0x1a8] sm:$0xf0]  ;;  %v674_v9 = vld [vmem:[%s4989_s6] sm:$0x3] }
 0x168   : > { %v626_v17 = vmul.f32 0.2, %v599_v14  ;;  %v2951_v8 = vor.u32 %v3270_v7, %v2950_v6  ;;  %v4049_v12 = vperm.slane %v674_v9, 0  ;;  %v4051_v35 = vperm.slane %v674_v9, 1 }
 0x169   : > { %1711 = vmatpush.bf16.msrb.mxu1 %v3055_v11  ;;  %1807 = vmatpush.bf16.msra.mxu3 %v3115_v15  ;;  %v657_v60 = vpack.c.bf16 %v649_v50, %v648_v49  ;;  %v2922_v15 = vld [vmem:[%s4990_s7 + $0x158] sm:$0xf] }
 0x16a   : > { %v642_v20 = vmax.f32 %v599_v14, %v626_v17  ;;  %v2891_v14 = vor.u32 %v3252_v4, %v2888_v5  ;;  %v646_v17 = vmax.f32 %v609_v45, %v630_v47  ;;  %v3031_v45 = vor.u32 %v3287_v42, %v3028_v43  ;;  %v3220_v47 = vld [vmem:[%s4990_s7 + $0x18] sm:$0xf0]  ;;  %v3146_v42 = vld [vmem:[%s4990_s7 + $0x318] sm:$0xf] }
 0x16b   : > { %v2751_v4 = vor.u32 %v3217_v63, %v2748_v1  ;;  %v2975_v5 = vor.u32 %v3273_v2, %v2972_v3  ;;  %v3249_v1 = vld [vmem:[%s4990_s7 + $0x100] sm:$0xf0]  ;;  %v3118_v2 = vld [vmem:[%s4990_s7 + $0x2e0] sm:$0xf] }
 0x16c   : > { %1758 = vmatpush.bf16.msra.mxu2 %v2891_v14 }
 0x16d   : > { %v600_v16 = vpop.f32.mrf.mxu1  ;;  %1712 = vmatpush.bf16.msrb.mxu1 %v3027_v40  ;;  %v2894_v40 = vld [vmem:[%s4990_s7 + $0x120] sm:$0xf] }
 0x16e   : > { %v601_v18 = vadd.f32 %v3830_v28, %v600_v16  ;;  %v3245_v16 = vld [vmem:[%s4990_s7 + $0xe4] sm:$0xf]  ;;  %v3059_v28 = vor.u32 %v3294_v32, %v3056_v33  ;;  %v2895_v43 = vor.u32 %v3256_v41, %v2894_v40 }
 0x170   : > { %v627_v19 = vmul.f32 0.2, %v601_v18 }
 0x171   : > { %1713 = vmatpush.bf16.msrb.mxu1 %v2999_v54 }
 0x172   : > { %v643_v21 = vmax.f32 %v601_v18, %v627_v19  ;;  %v647_v18 = vmax.f32 %v611_v55, %v631_v10  ;;  %v2860_v19 = vld [vmem:[%s4990_s7 + $0xfc] sm:$0xf0]  ;;  %v2776_v55 = vld [vmem:[%s4990_s7 + $0x54] sm:$0xf0] }
 0x173   : > { %v2779_v58 = vor.u32 %v3224_v53, %v2776_v55 }
 0x174   : > { %v654_v22 = vpack.c.bf16 %v643_v21, %v642_v20  ;;  %v3301_v20 = vld [vmem:[%s4990_s7 + $0x2a4] sm:$0xf]  ;;  %v3084_v21 = vld [vmem:[%s4990_s7 + $0x2bc] sm:$0xf0]  ;;  %v656_v25 = vpack.c.bf16 %v647_v18, %v646_v17  ;;  %v3174_v17 = vld [vmem:[%s4990_s7 + $0x350] sm:$0xf] }
 0x175   : > { %v3087_v23 = vor.u32 %v3301_v20, %v3084_v21  ;;  %1714 = vmatpush.bf16.msrb.mxu1 %v2971_v0  ;;  %v2866_v0 = vld [vmem:[%s4990_s7 + $0xe8] sm:$0xf] }
 0x176   : > { %788 = vmatmul.bf16.gmra.mxu2 %v654_v22  ;;  %837 = vmatmul.bf16.gmra.mxu3 %v654_v22  ;;  %v2863_v22 = vor.u32 %v3245_v16, %v2860_v19  ;;  %v3263_v16 = vld [vmem:[%s4990_s7 + $0x170] sm:$0xf0]  ;;  %v3326_v19 = vld [vmem:[%s4990_s7 + $0x368] sm:$0xf0]  ;;  %v2867_v3 = vor.u32 %v3249_v1, %v2866_v0 }
 0x177   : > { %1808 = vmatpush.bf16.msra.mxu3 %v3087_v23  ;;  %v2923_v18 = vor.u32 %v3263_v16, %v2922_v15  ;;  %v3175_v20 = vor.u32 %v3326_v19, %v3174_v17 }
 0x178   : > { %1759 = vmatpush.bf16.msra.mxu2 %v2863_v22 }
 0x179   : > { %1903 = vmatpush.bf16.msra.mxu1 %v3175_v20 }
 0x17b   : > { %1809 = vmatpush.bf16.msra.mxu3 %v3059_v28 }
 0x17c   : > { %1760 = vmatpush.bf16.msra.mxu2 %v2835_v31 }
 0x17f   : > { %1810 = vmatpush.bf16.msra.mxu3 %v3031_v45 }
 0x180   : > { %1761 = vmatpush.bf16.msra.mxu2 %v2807_v44  ;;  %v3319_v44 = vld [vmem:[%s4990_s7 + $0x330] sm:$0xf0] }
 0x181   : > { %v3147_v45 = vor.u32 %v3319_v44, %v3146_v42 }
 0x183   : > { %1811 = vmatpush.bf16.msra.mxu3 %v3003_v59  ;;  %1904 = vmatpush.bf16.msra.mxu1 %v3147_v45 }
 0x184   : > { %1762 = vmatpush.bf16.msra.mxu2 %v2779_v58 }
 0x186   : > { %793 = vmatmul.bf16.gmra.mxu2 %v655_v46  ;;  %842 = vmatmul.bf16.gmra.mxu3 %v655_v46  ;;  %v2746_v46 = vld [vmem:[%s4990_s7] sm:$0xf] }
 0x187   : > { %v2747_v48 = vor.u32 %v3220_v47, %v2746_v46  ;;  %1812 = vmatpush.bf16.msra.mxu3 %v2975_v5 }
 0x188   : > { %1763 = vmatpush.bf16.msra.mxu2 %v2751_v4  ;;  %v3312_v4 = vld [vmem:[%s4990_s7 + $0x2f8] sm:$0xf0] }
 0x189   : > { %1665 = vmatpush.bf16.msrb.mxu0 %v2747_v48  ;;  %v3119_v5 = vor.u32 %v3312_v4, %v3118_v2 }
 0x18b   : > { %1905 = vmatpush.bf16.msra.mxu1 %v3119_v5 }
 0x18d   : > { %1854 = vmatpush.bf16.msra.mxu0 %v2951_v8 }
 0x191   : > { %1855 = vmatpush.bf16.msra.mxu0 %v2923_v18 }
 0x195   : > { %1856 = vmatpush.bf16.msra.mxu0 %v2895_v43 }
 0x196   : > { %798 = vmatmul.bf16.gmra.mxu2 %v656_v25  ;;  %847 = vmatmul.bf16.gmra.mxu3 %v656_v25 }
 0x199   : > { %1857 = vmatpush.bf16.msra.mxu0 %v2867_v3 }
 0x1a6   : > { %803 = vmatmul.bf16.gmra.mxu2 %v657_v60  ;;  %852 = vmatmul.bf16.gmra.mxu3 %v657_v60 }
 0x1b9   : > { %v769_v10 = vpop.f32.mrf.mxu2  ;;  %v818_v11 = vpop.f32.mrf.mxu3 }
 0x1ba   : > { %v770_v13 = vadd.f32 %v769_v10, %v4049_v12  ;;  %v819_v14 = vadd.f32 %v818_v11, %v4051_v35 }
 0x1bc   : > { %v858_v23 = vmul.f32 0.2, %v770_v13  ;;  %v859_v24 = vmul.f32 0.2, %v819_v14 }
 0x1be   : > { %v890_v30 = vmax.f32 %v770_v13, %v858_v23  ;;  %v891_v31 = vmax.f32 %v819_v14, %v859_v24 }
 0x1c1   : > { %v771_v21 = vpop.f32.mrf.mxu2  ;;  %v820_v22 = vpop.f32.mrf.mxu3 }
 0x1c2   : > { %v772_v25 = vadd.f32 %v771_v21, %v4049_v12  ;;  %v821_v26 = vadd.f32 %v820_v22, %v4051_v35 }
 0x1c4   : > { %v860_v27 = vmul.f32 0.2, %v772_v25  ;;  %v861_v29 = vmul.f32 0.2, %v821_v26 }
 0x1c6   : > { %v892_v32 = vmax.f32 %v772_v25, %v860_v27  ;;  %v893_v33 = vmax.f32 %v821_v26, %v861_v29  ;;  %v2838_v25 = vld [vmem:[%s4990_s7 + $0xb0] sm:$0xf]  ;;  %v3242_v26 = vld [vmem:[%s4990_s7 + $0xc8] sm:$0xf0]  ;;  %v3090_v27 = vld [vmem:[%s4990_s7 + $0x2a8] sm:$0xf] }
 0x1c7   : > { %v2839_v29 = vor.u32 %v3242_v26, %v2838_v25  ;;  %v2782_v26 = vld [vmem:[%s4990_s7 + $0x40] sm:$0xf] }
 0x1c8   : > { %v4069_v28 = vpack.c.bf16 %v892_v32, %v890_v30  ;;  %v4071_v34 = vpack.c.bf16 %v893_v33, %v891_v31  ;;  %v3305_v30 = vld [vmem:[%s4990_s7 + $0x2c0] sm:$0xf0] }
 0x1c9   : > { %v774_v36 = vpop.f32.mrf.mxu2  ;;  %v823_v37 = vpop.f32.mrf.mxu3  ;;  %v3091_v31 = vor.u32 %v3305_v30, %v3090_v27  ;;  %1858 = vmatpush.bf16.msra.mxu0 %v2839_v29  ;;  %v3228_v27 = vld [vmem:[%s4990_s7 + $0x58] sm:$0xf0]  ;;  %v3034_v29 = vld [vmem:[%s4990_s7 + $0x238] sm:$0xf] }
 0x1ca   : > { %1666 = vmatmul.bf16.vlgmr.msrb.gmra.mxu0 %v4069_v28  ;;  %1715 = vmatmul.bf16.vlgmr.msrb.gmra.mxu1 %v4071_v34  ;;  %v775_v38 = vadd.f32 %v774_v36, %v4049_v12  ;;  %v824_v39 = vadd.f32 %v823_v37, %v4051_v35 }
 0x1cb   : > { %1764 = vmatmul.bf16.vlgmr.msra.gmra.mxu2 %v4069_v28  ;;  %1813 = vmatmul.bf16.vlgmr.msra.gmra.mxu3 %v4071_v34 }
 0x1cc   : > { %v862_v48 = vmul.f32 0.2, %v775_v38  ;;  %v863_v49 = vmul.f32 0.2, %v824_v39  ;;  %1906 = vmatpush.bf16.msra.mxu1 %v3091_v31  ;;  %v2783_v31 = vor.u32 %v3228_v27, %v2782_v26  ;;  %v3288_v26 = vld [vmem:[%s4990_s7 + $0x23c] sm:$0xf] }
 0x1ce   : > { %v894_v54 = vmax.f32 %v775_v38, %v862_v48  ;;  %v895_v55 = vmax.f32 %v824_v39, %v863_v49 }
 0x1d1   : > { %v776_v46 = vpop.f32.mrf.mxu2  ;;  %v825_v47 = vpop.f32.mrf.mxu3 }
 0x1d2   : > { %v777_v50 = vadd.f32 %v776_v46, %v4049_v12  ;;  %v826_v51 = vadd.f32 %v825_v47, %v4051_v35 }
 0x1d4   : > { %v864_v52 = vmul.f32 0.2, %v777_v50  ;;  %v865_v53 = vmul.f32 0.2, %v826_v51 }
 0x1d6   : > { %v896_v56 = vmax.f32 %v777_v50, %v864_v52  ;;  %v897_v57 = vmax.f32 %v826_v51, %v865_v53  ;;  %v2810_v52 = vld [vmem:[%s4990_s7 + $0x78] sm:$0xf]  ;;  %v3235_v53 = vld [vmem:[%s4990_s7 + $0x90] sm:$0xf0] }
 0x1d8   : > { %v4093_v58 = vpack.c.bf16 %v896_v56, %v894_v54  ;;  %v4095_v59 = vpack.c.bf16 %v897_v57, %v895_v55  ;;  %v3062_v54 = vld [vmem:[%s4990_s7 + $0x270] sm:$0xf]  ;;  %v2811_v55 = vor.u32 %v3235_v53, %v2810_v52  ;;  %v3298_v56 = vld [vmem:[%s4990_s7 + $0x288] sm:$0xf0] }
 0x1d9   : > { %v779_v60 = vpop.f32.mrf.mxu2  ;;  %v828_v61 = vpop.f32.mrf.mxu3  ;;  %v3063_v57 = vor.u32 %v3298_v56, %v3062_v54  ;;  %v2868_v56 = vld [vmem:[%s4990_s7 + $0x104] sm:$0xf0] }
 0x1da   : > { %1671 = vmatmul.bf16.gmra.mxu0 %v4093_v58  ;;  %1720 = vmatmul.bf16.gmra.mxu1 %v4095_v59  ;;  %v780_v62 = vadd.f32 %v779_v60, %v4049_v12  ;;  %v829_v63 = vadd.f32 %v828_v61, %v4051_v35 }
 0x1db   : > { %1769 = vmatmul.bf16.gmra.mxu2 %v4093_v58  ;;  %1818 = vmatmul.bf16.gmra.mxu3 %v4095_v59 }
 0x1dc   : > { %v866_v8 = vmul.f32 0.2, %v780_v62  ;;  %v867_v9 = vmul.f32 0.2, %v829_v63  ;;  %1859 = vmatpush.bf16.msra.mxu0 %v2811_v55  ;;  %1907 = vmatpush.bf16.msra.mxu1 %v3063_v57  ;;  %v3246_v55 = vld [vmem:[%s4990_s7 + $0xec] sm:$0xf] }
 0x1dd   : > { %v3302_v57 = vld [vmem:[%s4990_s7 + $0x2ac] sm:$0xf] }
 0x1de   : > { %v898_v15 = vmax.f32 %v780_v62, %v866_v8  ;;  %v899_v16 = vmax.f32 %v829_v63, %v867_v9 }
 0x1e0   : > { %1860 = vmatpush.bf16.msra.mxu0 %v2783_v31  ;;  %v3225_v31 = vld [vmem:[%s4990_s7 + $0x44] sm:$0xf] }
 0x1e1   : > { %v781_v6 = vpop.f32.mrf.mxu2  ;;  %v830_v7 = vpop.f32.mrf.mxu3 }
 0x1e2   : > { %v782_v10 = vadd.f32 %v781_v6, %v4049_v12  ;;  %v831_v11 = vadd.f32 %v830_v7, %v4051_v35 }
 0x1e4   : > { %v868_v13 = vmul.f32 0.2, %v782_v10  ;;  %v869_v14 = vmul.f32 0.2, %v831_v11 }
 0x1e6   : > { %v900_v17 = vmax.f32 %v782_v10, %v868_v13  ;;  %v901_v18 = vmax.f32 %v831_v11, %v869_v14  ;;  %v3267_v13 = vld [vmem:[%s4990_s7 + $0x194] sm:$0xf]  ;;  %v2952_v14 = vld [vmem:[%s4990_s7 + $0x1ac] sm:$0xf0] }
 0x1e8   : > { %v4117_v19 = vpack.c.bf16 %v900_v17, %v898_v15  ;;  %v4119_v20 = vpack.c.bf16 %v901_v18, %v899_v16  ;;  %v3323_v15 = vld [vmem:[%s4990_s7 + $0x354] sm:$0xf]  ;;  %v2955_v16 = vor.u32 %v3267_v13, %v2952_v14  ;;  %v3176_v17 = vld [vmem:[%s4990_s7 + $0x36c] sm:$0xf0]  ;;  %v2754_v14 = vld [vmem:[%s4990_s7 + $0x8] sm:$0xf] }
 0x1e9   : > { %v784_v21 = vpop.f32.mrf.mxu2  ;;  %v833_v22 = vpop.f32.mrf.mxu3  ;;  %v3179_v18 = vor.u32 %v3323_v15, %v3176_v17  ;;  %v3064_v13 = vld [vmem:[%s4990_s7 + $0x28c] sm:$0xf0]  ;;  %v3221_v15 = vld [vmem:[%s4990_s7 + $0x20] sm:$0xf0] }
 0x1ea   : > { %1676 = vmatmul.bf16.gmra.mxu0 %v4117_v19  ;;  %1725 = vmatmul.bf16.gmra.mxu1 %v4119_v20  ;;  %v785_v23 = vadd.f32 %v784_v21, %v4049_v12  ;;  %v834_v24 = vadd.f32 %v833_v22, %v4051_v35  ;;  %v3260_v22 = vld [vmem:[%s4990_s7 + $0x15c] sm:$0xf]  ;;  %v2755_v17 = vor.u32 %v3221_v15, %v2754_v14 }
 0x1eb   : > { %1774 = vmatmul.bf16.gmra.mxu2 %v4117_v19  ;;  %1823 = vmatmul.bf16.gmra.mxu3 %v4119_v20 }
 0x1ec   : > { %v870_v36 = vmul.f32 0.2, %v785_v23  ;;  %v871_v37 = vmul.f32 0.2, %v834_v24  ;;  %1952 = vmatpush.bf16.msrb.mxu2 %v2955_v16  ;;  %2001 = vmatpush.bf16.msrb.mxu3 %v3179_v18  ;;  %v3006_v16 = vld [vmem:[%s4990_s7 + $0x200] sm:$0xf] }
 0x1ed   : > { %1861 = vmatpush.bf16.msra.mxu0 %v2755_v17 }
 0x1ee   : > { %v902_v42 = vmax.f32 %v785_v23, %v870_v36  ;;  %v903_v43 = vmax.f32 %v834_v24, %v871_v37  ;;  %v2924_v23 = vld [vmem:[%s4990_s7 + $0x174] sm:$0xf0]  ;;  %v3316_v24 = vld [vmem:[%s4990_s7 + $0x31c] sm:$0xf] }
 0x1ef   : > { %v2927_v30 = vor.u32 %v3260_v22, %v2924_v23 }
 0x1f1   : > { %v786_v32 = vpop.f32.mrf.mxu2  ;;  %v835_v33 = vpop.f32.mrf.mxu3  ;;  %1953 = vmatpush.bf16.msrb.mxu2 %v2927_v30  ;;  %v3036_v30 = vld [vmem:[%s4990_s7 + $0x254] sm:$0xf0] }
 0x1f2   : > { %v787_v38 = vadd.f32 %v786_v32, %v4049_v12  ;;  %v836_v39 = vadd.f32 %v835_v33, %v4051_v35  ;;  %v3291_v32 = vld [vmem:[%s4990_s7 + $0x250] sm:$0xf0]  ;;  %v3148_v33 = vld [vmem:[%s4990_s7 + $0x334] sm:$0xf0] }
 0x1f3   : > { %v3035_v37 = vor.u32 %v3291_v32, %v3034_v29  ;;  %v2784_v32 = vld [vmem:[%s4990_s7 + $0x5c] sm:$0xf0] }
 0x1f4   : > { %v872_v40 = vmul.f32 0.2, %v787_v38  ;;  %v873_v41 = vmul.f32 0.2, %v836_v39 }
 0x1f5   : > { %1908 = vmatpush.bf16.msra.mxu1 %v3035_v37 }
 0x1f6   : > { %v904_v44 = vmax.f32 %v787_v38, %v872_v40  ;;  %v905_v45 = vmax.f32 %v836_v39, %v873_v41  ;;  %v3151_v38 = vor.u32 %v3316_v24, %v3148_v33  ;;  %v3253_v41 = vld [vmem:[%s4990_s7 + $0x124] sm:$0xf]  ;;  %v3232_v24 = vld [vmem:[%s4990_s7 + $0x7c] sm:$0xf]  ;;  %v3039_v33 = vor.u32 %v3288_v26, %v3036_v30 }
 0x1f8   : > { %v4141_v46 = vpack.c.bf16 %v904_v44, %v902_v42  ;;  %v4143_v47 = vpack.c.bf16 %v905_v45, %v903_v43  ;;  %v2896_v42 = vld [vmem:[%s4990_s7 + $0x13c] sm:$0xf0]  ;;  %v3309_v43 = vld [vmem:[%s4990_s7 + $0x2e4] sm:$0xf]  ;;  %2002 = vmatpush.bf16.msrb.mxu3 %v3151_v38 }
 0x1f9   : > { %v789_v48 = vpop.f32.mrf.mxu2  ;;  %v838_v49 = vpop.f32.mrf.mxu3 }
 0x1fa   : > { %1681 = vmatmul.bf16.gmra.mxu0 %v4141_v46  ;;  %1730 = vmatmul.bf16.gmra.mxu1 %v4143_v47  ;;  %v790_v50 = vadd.f32 %v789_v48, %v4049_v12  ;;  %v839_v51 = vadd.f32 %v838_v49, %v4051_v35  ;;  %v2899_v49 = vor.u32 %v3253_v41, %v2896_v42  ;;  %v3008_v41 = vld [vmem:[%s4990_s7 + $0x21c] sm:$0xf0] }
 0x1fb   : > { %1779 = vmatmul.bf16.gmra.mxu2 %v4141_v46  ;;  %1828 = vmatmul.bf16.gmra.mxu3 %v4143_v47 }
 0x1fc   : > { %v874_v62 = vmul.f32 0.2, %v790_v50  ;;  %v875_v63 = vmul.f32 0.2, %v839_v51  ;;  %1954 = vmatpush.bf16.msrb.mxu2 %v2899_v49 }
 0x1fe   : > { %v906_v4 = vmax.f32 %v790_v50, %v874_v62  ;;  %v907_v5 = vmax.f32 %v839_v51, %v875_v63  ;;  %v3120_v50 = vld [vmem:[%s4990_s7 + $0x2fc] sm:$0xf0]  ;;  %v2871_v63 = vor.u32 %v3246_v55, %v2868_v56 }
 0x1ff   : > { %v3123_v51 = vor.u32 %v3309_v43, %v3120_v50 }
 0x200   : > { %1955 = vmatpush.bf16.msrb.mxu2 %v2871_v63 }
 0x201   : > { %v791_v60 = vpop.f32.mrf.mxu2  ;;  %v840_v61 = vpop.f32.mrf.mxu3  ;;  %2003 = vmatpush.bf16.msrb.mxu3 %v3123_v51  ;;  %v2978_v51 = vld [vmem:[%s4990_s7 + $0x1c8] sm:$0xf] }
 0x202   : > { %v792_v0 = vadd.f32 %v791_v60, %v4049_v12  ;;  %v841_v1 = vadd.f32 %v840_v61, %v4051_v35 }
 0x204   : > { %v876_v2 = vmul.f32 0.2, %v792_v0  ;;  %v877_v3 = vmul.f32 0.2, %v841_v1 }
 0x206   : > { %v908_v6 = vmax.f32 %v792_v0, %v876_v2  ;;  %v909_v7 = vmax.f32 %v841_v1, %v877_v3  ;;  %v3092_v0 = vld [vmem:[%s4990_s7 + $0x2c4] sm:$0xf0] }
 0x207   : > { %v3095_v3 = vor.u32 %v3302_v57, %v3092_v0 }
 0x208   : > { %v4165_v8 = vpack.c.bf16 %v908_v6, %v906_v4  ;;  %v4167_v9 = vpack.c.bf16 %v909_v7, %v907_v5  ;;  %v3239_v6 = vld [vmem:[%s4990_s7 + $0xb4] sm:$0xf]  ;;  %v2840_v7 = vld [vmem:[%s4990_s7 + $0xcc] sm:$0xf0] }
 0x209   : > { %v794_v10 = vpop.f32.mrf.mxu2  ;;  %v843_v11 = vpop.f32.mrf.mxu3  ;;  %2004 = vmatpush.bf16.msrb.mxu3 %v3095_v3 }
 0x20a   : > { %1686 = vmatmul.bf16.gmra.mxu0 %v4165_v8  ;;  %1735 = vmatmul.bf16.gmra.mxu1 %v4167_v9  ;;  %v795_v21 = vadd.f32 %v794_v10, %v4049_v12  ;;  %v844_v25 = vadd.f32 %v843_v11, %v4051_v35  ;;  %v3295_v10 = vld [vmem:[%s4990_s7 + $0x274] sm:$0xf]  ;;  %v2843_v11 = vor.u32 %v3239_v6, %v2840_v7 }
 0x20b   : > { %1784 = vmatmul.bf16.gmra.mxu2 %v4165_v8  ;;  %1833 = vmatmul.bf16.gmra.mxu3 %v4167_v9  ;;  %v3067_v18 = vor.u32 %v3295_v10, %v3064_v13 }
 0x20c   : > { %v878_v36 = vmul.f32 0.2, %v795_v21  ;;  %v879_v44 = vmul.f32 0.2, %v844_v25  ;;  %1956 = vmatpush.bf16.msrb.mxu2 %v2843_v11 }
 0x20d   : > { %2005 = vmatpush.bf16.msrb.mxu3 %v3067_v18  ;;  %v2958_v18 = vld [vmem:[%s4990_s7 + $0x198] sm:$0xf] }
 0x20e   : > { %v910_v54 = vmax.f32 %v795_v21, %v878_v36  ;;  %v911_v60 = vmax.f32 %v844_v25, %v879_v44  ;;  %v3284_v21 = vld [vmem:[%s4990_s7 + $0x218] sm:$0xf0]  ;;  %v2812_v25 = vld [vmem:[%s4990_s7 + $0x94] sm:$0xf0]  ;;  %v2787_v36 = vor.u32 %v3225_v31, %v2784_v32  ;;  %v2930_v31 = vld [vmem:[%s4990_s7 + $0x160] sm:$0xf] }
 0x20f   : > { %v3007_v23 = vor.u32 %v3284_v21, %v3006_v16  ;;  %v2815_v29 = vor.u32 %v3232_v24, %v2812_v25  ;;  %v3271_v21 = vld [vmem:[%s4990_s7 + $0x1b0] sm:$0xf0]  ;;  %v3264_v32 = vld [vmem:[%s4990_s7 + $0x178] sm:$0xf0] }
 0x210   : > { %v2959_v24 = vor.u32 %v3271_v21, %v2958_v18 }
 0x211   : > { %v796_v39 = vpop.f32.mrf.mxu2  ;;  %v845_v40 = vpop.f32.mrf.mxu3  ;;  %1909 = vmatpush.bf16.msra.mxu1 %v3007_v23  ;;  %1957 = vmatpush.bf16.msrb.mxu2 %v2815_v29 }
 0x212   : > { %v797_v45 = vadd.f32 %v796_v39, %v4049_v12  ;;  %v846_v48 = vadd.f32 %v845_v40, %v4051_v35  ;;  %v3281_v40 = vld [vmem:[%s4990_s7 + $0x204] sm:$0xf]  ;;  %2006 = vmatpush.bf16.msrb.mxu3 %v3039_v33  ;;  %2050 = vmatpush.bf16.msrb.mxu0 %v2959_v24  ;;  %v3182_v33 = vld [vmem:[%s4990_s7 + $0x358] sm:$0xf] }
 0x213   : > { %v3011_v49 = vor.u32 %v3281_v40, %v3008_v41 }
 0x214   : > { %v880_v52 = vmul.f32 0.2, %v797_v45  ;;  %v881_v53 = vmul.f32 0.2, %v846_v48 }
 0x215   : > { %1958 = vmatpush.bf16.msrb.mxu2 %v2787_v36 }
 0x216   : > { %v912_v61 = vmax.f32 %v797_v45, %v880_v52  ;;  %v913_v62 = vmax.f32 %v846_v48, %v881_v53  ;;  %v3277_v52 = vld [vmem:[%s4990_s7 + $0x1e0] sm:$0xf0]  ;;  %v3218_v53 = vld [vmem:[%s4990_s7 + $0xc] sm:$0xf]  ;;  %2007 = vmatpush.bf16.msrb.mxu3 %v3011_v49 }
 0x217   : > { %v2979_v57 = vor.u32 %v3277_v52, %v2978_v51 }
 0x218   : > { %v4237_v1 = vpack.c.bf16 %v912_v61, %v910_v54  ;;  %v4239_v2 = vpack.c.bf16 %v913_v62, %v911_v60  ;;  %v2756_v60 = vld [vmem:[%s4990_s7 + $0x24] sm:$0xf0]  ;;  %v3274_v61 = vld [vmem:[%s4990_s7 + $0x1cc] sm:$0xf] }
 0x219   : > { %v799_v4 = vpop.f32.mrf.mxu2  ;;  %v848_v5 = vpop.f32.mrf.mxu3  ;;  %v2980_v62 = vld [vmem:[%s4990_s7 + $0x1e4] sm:$0xf0]  ;;  %v2759_v63 = vor.u32 %v3218_v53, %v2756_v60  ;;  %1910 = vmatpush.bf16.msra.mxu1 %v2979_v57  ;;  %v3257_v57 = vld [vmem:[%s4990_s7 + $0x140] sm:$0xf0]  ;;  %v3154_v60 = vld [vmem:[%s4990_s7 + $0x320] sm:$0xf] }
 0x21a   : > { %1691 = vmatmul.bf16.gmra.mxu0 %v4237_v1  ;;  %1740 = vmatmul.bf16.gmra.mxu1 %v4239_v2  ;;  %v800_v22 = vadd.f32 %v799_v4, %v4049_v12  ;;  %v849_v27 = vadd.f32 %v848_v5, %v4051_v35  ;;  %v2983_v4 = vor.u32 %v3274_v61, %v2980_v62  ;;  %v3320_v62 = vld [vmem:[%s4990_s7 + $0x338] sm:$0xf0] }
 0x21b   : > { %1789 = vmatmul.bf16.gmra.mxu2 %v4237_v1  ;;  %1838 = vmatmul.bf16.gmra.mxu3 %v4239_v2 }
 0x21c   : > { %v882_v37 = vmul.f32 0.2, %v800_v22  ;;  %v883_v42 = vmul.f32 0.2, %v849_v27  ;;  %1959 = vmatpush.bf16.msrb.mxu2 %v2759_v63  ;;  %2008 = vmatpush.bf16.msrb.mxu3 %v2983_v4  ;;  %v3155_v63 = vor.u32 %v3320_v62, %v3154_v60 }
 0x21e   : > { %v914_v50 = vmax.f32 %v800_v22, %v882_v37  ;;  %v915_v54 = vmax.f32 %v849_v27, %v883_v42  ;;  %v2931_v37 = vor.u32 %v3264_v32, %v2930_v31  ;;  %v2874_v31 = vld [vmem:[%s4990_s7 + $0xf0] sm:$0xf]  ;;  %v3250_v32 = vld [vmem:[%s4990_s7 + $0x108] sm:$0xf0] }
 0x220   : > { %2051 = vmatpush.bf16.msrb.mxu0 %v2931_v37  ;;  %v3126_v37 = vld [vmem:[%s4990_s7 + $0x2e8] sm:$0xf] }
 0x221   : > { %v801_v38 = vpop.f32.mrf.mxu2  ;;  %v850_v39 = vpop.f32.mrf.mxu3 }
 0x222   : > { %v802_v43 = vadd.f32 %v801_v38, %v4049_v12  ;;  %v851_v44 = vadd.f32 %v850_v39, %v4051_v35  ;;  %v3327_v38 = vld [vmem:[%s4990_s7 + $0x370] sm:$0xf0] }
 0x223   : > { %v3183_v39 = vor.u32 %v3327_v38, %v3182_v33  ;;  %v2875_v33 = vor.u32 %v3250_v32, %v2874_v31  ;;  %v3313_v38 = vld [vmem:[%s4990_s7 + $0x300] sm:$0xf0] }
 0x224   : > { %v884_v45 = vmul.f32 0.2, %v802_v43  ;;  %v885_v48 = vmul.f32 0.2, %v851_v44 }
 0x225   : > { %2099 = vmatpush.bf16.msrb.mxu1 %v3183_v39  ;;  %v3127_v39 = vor.u32 %v3313_v38, %v3126_v37 }
 0x226   : > { %v916_v55 = vmax.f32 %v802_v43, %v884_v45  ;;  %v917_v56 = vmax.f32 %v851_v44, %v885_v48 }
 0x228   : > { %v4315_v0 = vpack.c.bf16 %v916_v55, %v914_v50  ;;  %v4317_v3 = vpack.c.bf16 %v917_v56, %v915_v54  ;;  %v2902_v56 = vld [vmem:[%s4990_s7 + $0x128] sm:$0xf] }
 0x229   : > { %v804_v5 = vpop.f32.mrf.mxu2  ;;  %v853_v6 = vpop.f32.mrf.mxu3  ;;  %v2903_v61 = vor.u32 %v3257_v57, %v2902_v56  ;;  %2100 = vmatpush.bf16.msrb.mxu1 %v3155_v63 }
 0x22a   : > { %1696 = vmatmul.bf16.gmra.mxu0 %v4315_v0  ;;  %1745 = vmatmul.bf16.gmra.mxu1 %v4317_v3  ;;  %v805_v7 = vadd.f32 %v804_v5, %v4049_v12  ;;  %v854_v10 = vadd.f32 %v853_v6, %v4051_v35 }
 0x22b   : > { %1794 = vmatmul.bf16.gmra.mxu2 %v4315_v0  ;;  %1843 = vmatmul.bf16.gmra.mxu3 %v4317_v3 }
 0x22c   : > { %v886_v14 = vmul.f32 0.2, %v805_v7  ;;  %v887_v15 = vmul.f32 0.2, %v854_v10  ;;  %2052 = vmatpush.bf16.msrb.mxu0 %v2903_v61 }
 0x22d   : > { %2101 = vmatpush.bf16.msrb.mxu1 %v3127_v39 }
 0x22e   : > { %v918_v25 = vmax.f32 %v805_v7, %v886_v14  ;;  %v919_v26 = vmax.f32 %v854_v10, %v887_v15 }
 0x230   : > { %2053 = vmatpush.bf16.msrb.mxu0 %v2875_v33 }
 0x231   : > { %v806_v11 = vpop.f32.mrf.mxu2  ;;  %v855_v13 = vpop.f32.mrf.mxu3 }
 0x232   : > { %v807_v16 = vadd.f32 %v806_v11, %v4049_v12  ;;  %v856_v17 = vadd.f32 %v855_v13, %v4051_v35  ;;  %v4344_v35 = vld [vmem:[%s4991_s8] sm:$0x7f] }
 0x233   : > { %v4356_v36 = vperm.slane %v4344_v35, 0  ;;  %v4367_v44 = vperm.slane %v4344_v35, 1 }
 0x234   : > { %v888_v22 = vmul.f32 0.2, %v807_v16  ;;  %v889_v23 = vmul.f32 0.2, %v856_v17 }
 0x236   : > { %v920_v27 = vmax.f32 %v807_v16, %v888_v22  ;;  %v921_v29 = vmax.f32 %v856_v17, %v889_v23 }
 0x238   : > { %v4333_v30 = vpack.c.bf16 %v920_v27, %v918_v25  ;;  %v4335_v12 = vpack.c.bf16 %v921_v29, %v919_v26 }
 0x23a   : > { %1701 = vmatmul.bf16.gmra.mxu0 %v4333_v30  ;;  %1750 = vmatmul.bf16.gmra.mxu1 %v4335_v12 }
 0x23b   : > { %1799 = vmatmul.bf16.gmra.mxu2 %v4333_v30  ;;  %1848 = vmatmul.bf16.gmra.mxu3 %v4335_v12 }
 0x247   : > { %v1667_v40 = vpop.f32.mrf.mxu0  ;;  %v1716_v41 = vpop.f32.mrf.mxu1 }
 0x248   : > { %v1668_v42 = vadd.f32 %v1667_v40, %v4356_v36 }
 0x24a   : > { %v1717_v43 = vadd.f32 %v1716_v41, %v1668_v42  ;;  %1862 = vmatmul.bf16.vlgmr.msra.gmra.mxu0 %v4069_v28  ;;  %1911 = vmatmul.bf16.vlgmr.msra.gmra.mxu1 %v4071_v34 }
 0x24b   : > { %1960 = vmatmul.bf16.vlgmr.msrb.gmra.mxu2 %v4069_v28  ;;  %2009 = vmatmul.bf16.vlgmr.msrb.gmra.mxu3 %v4071_v34 }
 0x24c   : > { %3355 = vtanh.f32 %v1717_v43 }
 0x24e   : > { %v1765_v45 = vpop.f32.mrf.mxu2  ;;  %v1814_v48 = vpop.f32.mrf.mxu3 }
 0x24f   : > { %v1766_v49 = vadd.f32 %v1765_v45, %v4367_v44  ;;  %v1669_v50 = vpop.f32.mrf.mxu0  ;;  %v1718_v51 = vpop.f32.mrf.mxu1 }
 0x250   : > { %v1670_v52 = vadd.f32 %v1669_v50, %v4356_v36 }
 0x251   : > { %v1815_v53 = vadd.f32 %v1814_v48, %v1766_v49 }
 0x252   : > { %v3356_v54 = vpop.eup %3355  ;;  %v1719_v55 = vadd.f32 %v1718_v51, %v1670_v52 }
 0x253   : > { %2456 = vst [vmem:[%s4374_s13] sm:$0xff] %v3356_v54  ;;  %3357 = vtanh.f32 %v1815_v53 }
 0x254   : > { %3359 = vtanh.f32 %v1719_v55 }
 0x256   : > { %v1767_v4 = vpop.f32.mrf.mxu2  ;;  %v1816_v5 = vpop.f32.mrf.mxu3 }
 0x257   : > { %v1768_v6 = vadd.f32 %v1767_v4, %v4367_v44  ;;  %v1672_v7 = vpop.f32.mrf.mxu0  ;;  %v1721_v10 = vpop.f32.mrf.mxu1 }
 0x258   : > { %v1673_v11 = vadd.f32 %v1672_v7, %v4356_v36 }
 0x259   : > { %v3358_v13 = vpop.eup %3357  ;;  %v1817_v14 = vadd.f32 %v1816_v5, %v1768_v6  ;;  %v2846_v5 = vld [vmem:[%s4990_s7 + $0xb8] sm:$0xf]  ;;  %v3243_v6 = vld [vmem:[%s4990_s7 + $0xd0] sm:$0xf0] }
 0x25a   : > { %v3360_v15 = vpop.eup %3359  ;;  %2457 = vst [vmem:[%s4374_s13 + $0x8] sm:$0xff] %v3358_v13  ;;  %v1722_v16 = vadd.f32 %v1721_v10, %v1673_v11  ;;  %1867 = vmatmul.bf16.gmra.mxu0 %v4093_v58  ;;  %1916 = vmatmul.bf16.gmra.mxu1 %v4095_v59  ;;  %v2847_v7 = vor.u32 %v3243_v6, %v2846_v5  ;;  %v3098_v10 = vld [vmem:[%s4990_s7 + $0x2b0] sm:$0xf]  ;;  %v3306_v11 = vld [vmem:[%s4990_s7 + $0x2c8] sm:$0xf0] }
 0x25b   : > { %2464 = vst [vmem:[%s4374_s13 + $0x38] sm:$0xff] %v3360_v15  ;;  %3361 = vtanh.f32 %v1817_v14  ;;  %1965 = vmatmul.bf16.gmra.mxu2 %v4093_v58  ;;  %2014 = vmatmul.bf16.gmra.mxu3 %v4095_v59  ;;  %v3099_v13 = vor.u32 %v3306_v11, %v3098_v10  ;;  %v3184_v6 = vld [vmem:[%s4990_s7 + $0x374] sm:$0xf0]  ;;  %v3261_v10 = vld [vmem:[%s4990_s7 + $0x164] sm:$0xf] }
 0x25c   : > { %3363 = vtanh.f32 %v1722_v16  ;;  %2054 = vmatpush.bf16.msrb.mxu0 %v2847_v7  ;;  %v2932_v11 = vld [vmem:[%s4990_s7 + $0x17c] sm:$0xf0] }
 0x25d   : > { %2102 = vmatpush.bf16.msrb.mxu1 %v3099_v13  ;;  %v3317_v13 = vld [vmem:[%s4990_s7 + $0x324] sm:$0xf] }
 0x25e   : > { %v1770_v17 = vpop.f32.mrf.mxu2  ;;  %v1819_v18 = vpop.f32.mrf.mxu3 }
 0x25f   : > { %v1771_v21 = vadd.f32 %v1770_v17, %v4367_v44  ;;  %v1674_v22 = vpop.f32.mrf.mxu0  ;;  %v1723_v23 = vpop.f32.mrf.mxu1 }
 0x260   : > { %v1675_v24 = vadd.f32 %v1674_v22, %v4356_v36 }
 0x261   : > { %v3362_v25 = vpop.eup %3361  ;;  %v1820_v26 = vadd.f32 %v1819_v18, %v1771_v21 }
 0x262   : > { %v3364_v27 = vpop.eup %3363  ;;  %2465 = vst [vmem:[%s4374_s13 + $0x40] sm:$0xff] %v3362_v25  ;;  %v1724_v29 = vadd.f32 %v1723_v23, %v1675_v24 }
 0x263   : > { %2471 = vst [vmem:[%s4374_s13 + $0x70] sm:$0xff] %v3364_v27  ;;  %3365 = vtanh.f32 %v1820_v26 }
 0x264   : > { %3367 = vtanh.f32 %v1724_v29 }
 0x266   : > { %v1772_v40 = vpop.f32.mrf.mxu2  ;;  %v1821_v41 = vpop.f32.mrf.mxu3 }
 0x267   : > { %v1773_v42 = vadd.f32 %v1772_v40, %v4367_v44  ;;  %v1677_v43 = vpop.f32.mrf.mxu0  ;;  %v1726_v45 = vpop.f32.mrf.mxu1 }
 0x268   : > { %v1678_v48 = vadd.f32 %v1677_v43, %v4356_v36 }
 0x269   : > { %v3366_v49 = vpop.eup %3365  ;;  %v1822_v50 = vadd.f32 %v1821_v41, %v1773_v42  ;;  %v2818_v41 = vld [vmem:[%s4990_s7 + $0x80] sm:$0xf]  ;;  %v3236_v42 = vld [vmem:[%s4990_s7 + $0x98] sm:$0xf0] }
 0x26a   : > { %v3368_v51 = vpop.eup %3367  ;;  %2472 = vst [vmem:[%s4374_s13 + $0x78] sm:$0xff] %v3366_v49  ;;  %v1727_v52 = vadd.f32 %v1726_v45, %v1678_v48  ;;  %1872 = vmatmul.bf16.gmra.mxu0 %v4117_v19  ;;  %1921 = vmatmul.bf16.gmra.mxu1 %v4119_v20  ;;  %v2819_v43 = vor.u32 %v3236_v42, %v2818_v41  ;;  %v3070_v45 = vld [vmem:[%s4990_s7 + $0x278] sm:$0xf]  ;;  %v3299_v48 = vld [vmem:[%s4990_s7 + $0x290] sm:$0xf0] }
 0x26b   : > { %2478 = vst [vmem:[%s4374_s13 + $0xa8] sm:$0xff] %v3368_v51  ;;  %3369 = vtanh.f32 %v1822_v50  ;;  %1970 = vmatmul.bf16.gmra.mxu2 %v4117_v19  ;;  %2019 = vmatmul.bf16.gmra.mxu3 %v4119_v20  ;;  %v3071_v49 = vor.u32 %v3299_v48, %v3070_v45  ;;  %v3292_v45 = vld [vmem:[%s4990_s7 + $0x258] sm:$0xf0] }
 0x26c   : > { %3371 = vtanh.f32 %v1727_v52  ;;  %2055 = vmatpush.bf16.msrb.mxu0 %v2819_v43  ;;  %v3042_v43 = vld [vmem:[%s4990_s7 + $0x240] sm:$0xf] }
 0x26d   : > { %2103 = vmatpush.bf16.msrb.mxu1 %v3071_v49  ;;  %v3043_v48 = vor.u32 %v3292_v45, %v3042_v43  ;;  %v3247_v49 = vld [vmem:[%s4990_s7 + $0xf4] sm:$0xf]  ;;  %v2792_v43 = vld [vmem:[%s4990_s7 + $0x64] sm:$0xf0]  ;;  %v3282_v45 = vld [vmem:[%s4990_s7 + $0x20c] sm:$0xf] }
 0x26e   : > { %v1775_v53 = vpop.f32.mrf.mxu2  ;;  %v1824_v54 = vpop.f32.mrf.mxu3 }
 0x26f   : > { %v1776_v55 = vadd.f32 %v1775_v53, %v4367_v44  ;;  %v1679_v56 = vpop.f32.mrf.mxu0  ;;  %v1728_v57 = vpop.f32.mrf.mxu1 }
 0x270   : > { %v1680_v60 = vadd.f32 %v1679_v56, %v4356_v36 }
 0x271   : > { %v3370_v61 = vpop.eup %3369  ;;  %v1825_v62 = vadd.f32 %v1824_v54, %v1776_v55  ;;  %2104 = vmatpush.bf16.msrb.mxu1 %v3043_v48  ;;  %v2762_v48 = vld [vmem:[%s4990_s7 + $0x10] sm:$0xf] }
 0x272   : > { %v3372_v63 = vpop.eup %3371  ;;  %2479 = vst [vmem:[%s4374_s13 + $0xb0] sm:$0xff] %v3370_v61  ;;  %v1729_v4 = vadd.f32 %v1728_v57, %v1680_v60  ;;  %v3268_v60 = vld [vmem:[%s4990_s7 + $0x19c] sm:$0xf]  ;;  %v2960_v61 = vld [vmem:[%s4990_s7 + $0x1b4] sm:$0xf0] }
 0x273   : > { %2485 = vst [vmem:[%s4374_s13 + $0xe0] sm:$0xff] %v3372_v63  ;;  %3373 = vtanh.f32 %v1825_v62  ;;  %v3324_v62 = vld [vmem:[%s4990_s7 + $0x35c] sm:$0xf]  ;;  %v2963_v5 = vor.u32 %v3268_v60, %v2960_v61 }
 0x274   : > { %3375 = vtanh.f32 %v1729_v4  ;;  %v3187_v7 = vor.u32 %v3324_v62, %v3184_v6  ;;  %v2848_v6 = vld [vmem:[%s4990_s7 + $0xd4] sm:$0xf0] }
 0x275   : > { %2148 = vmatpush.bf16.msra.mxu2 %v2963_v5  ;;  %v3240_v5 = vld [vmem:[%s4990_s7 + $0xbc] sm:$0xf] }
 0x276   : > { %v1777_v14 = vpop.f32.mrf.mxu2  ;;  %v1826_v15 = vpop.f32.mrf.mxu3  ;;  %2197 = vmatpush.bf16.msra.mxu3 %v3187_v7  ;;  %v3296_v7 = vld [vmem:[%s4990_s7 + $0x27c] sm:$0xf] }
 0x277   : > { %v1778_v16 = vadd.f32 %v1777_v14, %v4367_v44  ;;  %v1682_v17 = vpop.f32.mrf.mxu0  ;;  %v1731_v18 = vpop.f32.mrf.mxu1 }
 0x278   : > { %v1683_v21 = vadd.f32 %v1682_v17, %v4356_v36  ;;  %v3156_v17 = vld [vmem:[%s4990_s7 + $0x33c] sm:$0xf0] }
 0x279   : > { %v3374_v22 = vpop.eup %3373  ;;  %v1827_v23 = vadd.f32 %v1826_v15, %v1778_v16  ;;  %v2935_v16 = vor.u32 %v3261_v10, %v2932_v11 }
 0x27a   : > { %v3376_v24 = vpop.eup %3375  ;;  %2486 = vst [vmem:[%s4374_s13 + $0xe8] sm:$0xff] %v3374_v22  ;;  %v1732_v25 = vadd.f32 %v1731_v18, %v1683_v21  ;;  %1877 = vmatmul.bf16.gmra.mxu0 %v4141_v46  ;;  %1926 = vmatmul.bf16.gmra.mxu1 %v4143_v47 }
 0x27b   : > { %2492 = vst [vmem:[%s4374_s13 + $0x118] sm:$0xff] %v3376_v24  ;;  %3377 = vtanh.f32 %v1827_v23  ;;  %1975 = vmatmul.bf16.gmra.mxu2 %v4141_v46  ;;  %2024 = vmatmul.bf16.gmra.mxu3 %v4143_v47  ;;  %v3159_v23 = vor.u32 %v3317_v13, %v3156_v17  ;;  %v2851_v13 = vor.u32 %v3240_v5, %v2848_v6  ;;  %v2820_v17 = vld [vmem:[%s4990_s7 + $0x9c] sm:$0xf0] }
 0x27c   : > { %3379 = vtanh.f32 %v1732_v25  ;;  %2149 = vmatpush.bf16.msra.mxu2 %v2935_v16  ;;  %v3233_v16 = vld [vmem:[%s4990_s7 + $0x84] sm:$0xf] }
 0x27d   : > { %2198 = vmatpush.bf16.msra.mxu3 %v3159_v23  ;;  %v2823_v23 = vor.u32 %v3233_v16, %v2820_v17 }
 0x27e   : > { %v1780_v26 = vpop.f32.mrf.mxu2  ;;  %v1829_v27 = vpop.f32.mrf.mxu3 }
 0x27f   : > { %v1781_v29 = vadd.f32 %v1780_v26, %v4367_v44  ;;  %v1684_v31 = vpop.f32.mrf.mxu0  ;;  %v1733_v32 = vpop.f32.mrf.mxu1 }
 0x280   : > { %v1685_v33 = vadd.f32 %v1684_v31, %v4356_v36  ;;  %v3310_v31 = vld [vmem:[%s4990_s7 + $0x2ec] sm:$0xf] }
 0x281   : > { %v3378_v37 = vpop.eup %3377  ;;  %v1830_v38 = vadd.f32 %v1829_v27, %v1781_v29  ;;  %v3254_v27 = vld [vmem:[%s4990_s7 + $0x12c] sm:$0xf]  ;;  %v2904_v29 = vld [vmem:[%s4990_s7 + $0x144] sm:$0xf0] }
 0x282   : > { %v3380_v39 = vpop.eup %3379  ;;  %2493 = vst [vmem:[%s4374_s13 + $0x120] sm:$0xff] %v3378_v37  ;;  %v1734_v40 = vadd.f32 %v1733_v32, %v1685_v33  ;;  %v2907_v37 = vor.u32 %v3254_v27, %v2904_v29 }
 0x283   : > { %2499 = vst [vmem:[%s4374_s13 + $0x150] sm:$0xff] %v3380_v39  ;;  %3381 = vtanh.f32 %v1830_v38  ;;  %v3128_v38 = vld [vmem:[%s4990_s7 + $0x304] sm:$0xf0] }
 0x284   : > { %3383 = vtanh.f32 %v1734_v40  ;;  %v2790_v39 = vld [vmem:[%s4990_s7 + $0x48] sm:$0xf]  ;;  %v3229_v40 = vld [vmem:[%s4990_s7 + $0x60] sm:$0xf0]  ;;  %v3131_v41 = vor.u32 %v3310_v31, %v3128_v38  ;;  %2150 = vmatpush.bf16.msra.mxu2 %v2907_v37 }
 0x285   : > { %v2791_v42 = vor.u32 %v3229_v40, %v2790_v39  ;;  %v3014_v37 = vld [vmem:[%s4990_s7 + $0x208] sm:$0xf]  ;;  %v3285_v38 = vld [vmem:[%s4990_s7 + $0x220] sm:$0xf0]  ;;  %v3226_v39 = vld [vmem:[%s4990_s7 + $0x4c] sm:$0xf] }
 0x286   : > { %v1782_v50 = vpop.f32.mrf.mxu2  ;;  %v1831_v51 = vpop.f32.mrf.mxu3  ;;  %2199 = vmatpush.bf16.msra.mxu3 %v3131_v41 }
 0x287   : > { %v1783_v52 = vadd.f32 %v1782_v50, %v4367_v44  ;;  %v1687_v53 = vpop.f32.mrf.mxu0  ;;  %v1736_v54 = vpop.f32.mrf.mxu1  ;;  %v2876_v50 = vld [vmem:[%s4990_s7 + $0x10c] sm:$0xf0]  ;;  %2056 = vmatpush.bf16.msrb.mxu0 %v2791_v42  ;;  %v3015_v42 = vor.u32 %v3285_v38, %v3014_v37 }
 0x288   : > { %v1688_v55 = vadd.f32 %v1687_v53, %v4356_v36 }
 0x289   : > { %v3382_v56 = vpop.eup %3381  ;;  %v1832_v57 = vadd.f32 %v1831_v51, %v1783_v52  ;;  %v3303_v51 = vld [vmem:[%s4990_s7 + $0x2b4] sm:$0xf]  ;;  %2105 = vmatpush.bf16.msrb.mxu1 %v3015_v42 }
 0x28a   : > { %v3384_v63 = vpop.eup %3383  ;;  %2500 = vst [vmem:[%s4374_s13 + $0x158] sm:$0xff] %v3382_v56  ;;  %v1737_v4 = vadd.f32 %v1736_v54, %v1688_v55  ;;  %1882 = vmatmul.bf16.gmra.mxu0 %v4165_v8  ;;  %1931 = vmatmul.bf16.gmra.mxu1 %v4167_v9  ;;  %v2879_v54 = vor.u32 %v3247_v49, %v2876_v50  ;;  %v3100_v55 = vld [vmem:[%s4990_s7 + $0x2cc] sm:$0xf0]  ;;  %v3222_v49 = vld [vmem:[%s4990_s7 + $0x28] sm:$0xf0] }
 0x28b   : > { %2506 = vst [vmem:[%s4374_s13 + $0x188] sm:$0xff] %v3384_v63  ;;  %3385 = vtanh.f32 %v1832_v57  ;;  %1980 = vmatmul.bf16.gmra.mxu2 %v4165_v8  ;;  %2029 = vmatmul.bf16.gmra.mxu3 %v4167_v9  ;;  %v3103_v61 = vor.u32 %v3303_v51, %v3100_v55  ;;  %v2795_v50 = vor.u32 %v3226_v39, %v2792_v43  ;;  %v3278_v55 = vld [vmem:[%s4990_s7 + $0x1e8] sm:$0xf0] }
 0x28c   : > { %3387 = vtanh.f32 %v1737_v4  ;;  %2151 = vmatpush.bf16.msra.mxu2 %v2879_v54  ;;  %v2763_v51 = vor.u32 %v3222_v49, %v2762_v48  ;;  %v2986_v54 = vld [vmem:[%s4990_s7 + $0x1d0] sm:$0xf] }
 0x28d   : > { %2200 = vmatpush.bf16.msra.mxu3 %v3103_v61  ;;  %v2987_v61 = vor.u32 %v3278_v55, %v2986_v54 }
 0x28e   : > { %v1785_v14 = vpop.f32.mrf.mxu2  ;;  %v1834_v15 = vpop.f32.mrf.mxu3  ;;  %2057 = vmatpush.bf16.msrb.mxu0 %v2763_v51 }
 0x28f   : > { %v1786_v18 = vadd.f32 %v1785_v14, %v4367_v44  ;;  %v1689_v21 = vpop.f32.mrf.mxu0  ;;  %v1738_v22 = vpop.f32.mrf.mxu1  ;;  %v3072_v14 = vld [vmem:[%s4990_s7 + $0x294] sm:$0xf0]  ;;  %2106 = vmatpush.bf16.msrb.mxu1 %v2987_v61 }
 0x290   : > { %v1690_v24 = vadd.f32 %v1689_v21, %v4356_v36  ;;  %2152 = vmatpush.bf16.msra.mxu2 %v2851_v13 }
 0x291   : > { %v3386_v25 = vpop.eup %3385  ;;  %v1835_v26 = vadd.f32 %v1834_v15, %v1786_v18  ;;  %v3075_v15 = vor.u32 %v3296_v7, %v3072_v14  ;;  %v3289_v18 = vld [vmem:[%s4990_s7 + $0x244] sm:$0xf] }
 0x292   : > { %v3388_v32 = vpop.eup %3387  ;;  %2507 = vst [vmem:[%s4374_s13 + $0x190] sm:$0xff] %v3386_v25  ;;  %v1739_v33 = vadd.f32 %v1738_v22, %v1690_v24  ;;  %v3044_v24 = vld [vmem:[%s4990_s7 + $0x25c] sm:$0xf0] }
 0x293   : > { %2513 = vst [vmem:[%s4374_s13 + $0x1c0] sm:$0xff] %v3388_v32  ;;  %3389 = vtanh.f32 %v1835_v26  ;;  %2201 = vmatpush.bf16.msra.mxu3 %v3075_v15  ;;  %v3047_v29 = vor.u32 %v3289_v18, %v3044_v24 }
 0x294   : > { %3391 = vtanh.f32 %v1739_v33  ;;  %2153 = vmatpush.bf16.msra.mxu2 %v2823_v23 }
 0x296   : > { %v1787_v52 = vpop.f32.mrf.mxu2  ;;  %v1836_v53 = vpop.f32.mrf.mxu3 }
 0x297   : > { %v1788_v56 = vadd.f32 %v1787_v52, %v4367_v44  ;;  %v1692_v57 = vpop.f32.mrf.mxu0  ;;  %v1741_v60 = vpop.f32.mrf.mxu1  ;;  %2202 = vmatpush.bf16.msra.mxu3 %v3047_v29  ;;  %v3016_v52 = vld [vmem:[%s4990_s7 + $0x224] sm:$0xf0] }
 0x298   : > { %v1693_v62 = vadd.f32 %v1692_v57, %v4356_v36  ;;  %2154 = vmatpush.bf16.msra.mxu2 %v2795_v50 }
 0x299   : > { %v3390_v63 = vpop.eup %3389  ;;  %v1837_v4 = vadd.f32 %v1836_v53, %v1788_v56  ;;  %v3019_v53 = vor.u32 %v3282_v45, %v3016_v52  ;;  %v3219_v56 = vld [vmem:[%s4990_s7 + $0x14] sm:$0xf] }
 0x29a   : > { %v3392_v10 = vpop.eup %3391  ;;  %2514 = vst [vmem:[%s4374_s13 + $0x1c8] sm:$0xff] %v3390_v63  ;;  %v1742_v11 = vadd.f32 %v1741_v60, %v1693_v62  ;;  %1887 = vmatmul.bf16.gmra.mxu0 %v4237_v1  ;;  %1936 = vmatmul.bf16.gmra.mxu1 %v4239_v2  ;;  %v2764_v62 = vld [vmem:[%s4990_s7 + $0x2c] sm:$0xf0]  ;;  %v3275_v63 = vld [vmem:[%s4990_s7 + $0x1d4] sm:$0xf] }
 0x29b   : > { %2520 = vst [vmem:[%s4374_s13 + $0x1f8] sm:$0xff] %v3392_v10  ;;  %3393 = vtanh.f32 %v1837_v4  ;;  %1985 = vmatmul.bf16.gmra.mxu2 %v4237_v1  ;;  %2034 = vmatmul.bf16.gmra.mxu3 %v4239_v2  ;;  %v2988_v4 = vld [vmem:[%s4990_s7 + $0x1ec] sm:$0xf0]  ;;  %v2767_v10 = vor.u32 %v3219_v56, %v2764_v62 }
 0x29c   : > { %3395 = vtanh.f32 %v1742_v11  ;;  %2203 = vmatpush.bf16.msra.mxu3 %v3019_v53  ;;  %v2991_v13 = vor.u32 %v3275_v63, %v2988_v4  ;;  %v2938_v63 = vld [vmem:[%s4990_s7 + $0x168] sm:$0xf]  ;;  %v3265_v4 = vld [vmem:[%s4990_s7 + $0x180] sm:$0xf0] }
 0x29d   : > { %2155 = vmatpush.bf16.msra.mxu2 %v2767_v10 }
 0x29e   : > { %v1790_v21 = vpop.f32.mrf.mxu2  ;;  %v1839_v22 = vpop.f32.mrf.mxu3 }
 0x29f   : > { %v1791_v25 = vadd.f32 %v1790_v21, %v4367_v44  ;;  %v1694_v26 = vpop.f32.mrf.mxu0  ;;  %v1743_v27 = vpop.f32.mrf.mxu1 }
 0x2a0   : > { %v1695_v31 = vadd.f32 %v1694_v26, %v4356_v36  ;;  %2204 = vmatpush.bf16.msra.mxu3 %v2991_v13 }
 0x2a1   : > { %v3394_v32 = vpop.eup %3393  ;;  %v1840_v33 = vadd.f32 %v1839_v22, %v1791_v25 }
 0x2a2   : > { %v3396_v40 = vpop.eup %3395  ;;  %2521 = vst [vmem:[%s4374_s13 + $0x200] sm:$0xff] %v3394_v32  ;;  %v1744_v41 = vadd.f32 %v1743_v27, %v1695_v31  ;;  %v2966_v32 = vld [vmem:[%s4990_s7 + $0x1a0] sm:$0xf] }
 0x2a3   : > { %2527 = vst [vmem:[%s4374_s13 + $0x230] sm:$0xff] %v3396_v40  ;;  %3397 = vtanh.f32 %v1840_v33  ;;  %v3272_v33 = vld [vmem:[%s4990_s7 + $0x1b8] sm:$0xf0] }
 0x2a4   : > { %3399 = vtanh.f32 %v1744_v41  ;;  %v2967_v37 = vor.u32 %v3272_v33, %v2966_v32 }
 0x2a6   : > { %v1792_v57 = vpop.f32.mrf.mxu2  ;;  %v1841_v60 = vpop.f32.mrf.mxu3  ;;  %2246 = vmatpush.bf16.msra.mxu0 %v2967_v37 }
 0x2a7   : > { %v1793_v5 = vadd.f32 %v1792_v57, %v4367_v44  ;;  %v1697_v6 = vpop.f32.mrf.mxu0  ;;  %v1746_v7 = vpop.f32.mrf.mxu1 }
 0x2a8   : > { %v1698_v11 = vadd.f32 %v1697_v6, %v4356_v36  ;;  %v3190_v6 = vld [vmem:[%s4990_s7 + $0x360] sm:$0xf] }
 0x2a9   : > { %v3398_v14 = vpop.eup %3397  ;;  %v1842_v15 = vadd.f32 %v1841_v60, %v1793_v5  ;;  %v4649_v5 = vperm.slane %v4344_v35, 2 }
 0x2aa   : > { %v3400_v16 = vpop.eup %3399  ;;  %2528 = vst [vmem:[%s4374_s13 + $0x238] sm:$0xff] %v3398_v14  ;;  %v1747_v17 = vadd.f32 %v1746_v7, %v1698_v11  ;;  %1892 = vmatmul.bf16.gmra.mxu0 %v4315_v0  ;;  %1941 = vmatmul.bf16.gmra.mxu1 %v4317_v3  ;;  %v3328_v7 = vld [vmem:[%s4990_s7 + $0x378] sm:$0xf0] }
 0x2ab   : > { %2534 = vst [vmem:[%s4374_s13 + $0x268] sm:$0xff] %v3400_v16  ;;  %3401 = vtanh.f32 %v1842_v15  ;;  %1990 = vmatmul.bf16.gmra.mxu2 %v4315_v0  ;;  %2039 = vmatmul.bf16.gmra.mxu3 %v4317_v3  ;;  %v3191_v10 = vor.u32 %v3328_v7, %v3190_v6 }
 0x2ac   : > { %3403 = vtanh.f32 %v1747_v17 }
 0x2ad   : > { %2295 = vmatpush.bf16.msra.mxu1 %v3191_v10  ;;  %3336 = vmatpush.bf16.msrb.mxu3 %v3191_v10 }
 0x2ae   : > { %v1795_v18 = vpop.f32.mrf.mxu2  ;;  %v1844_v21 = vpop.f32.mrf.mxu3 }
 0x2af   : > { %v1796_v22 = vadd.f32 %v1795_v18, %v4367_v44  ;;  %v1699_v23 = vpop.f32.mrf.mxu0  ;;  %v1748_v24 = vpop.f32.mrf.mxu1 }
 0x2b0   : > { %v1700_v25 = vadd.f32 %v1699_v23, %v4356_v36 }
 0x2b1   : > { %v3402_v26 = vpop.eup %3401  ;;  %v1845_v27 = vadd.f32 %v1844_v21, %v1796_v22 }
 0x2b2   : > { %v3404_v29 = vpop.eup %3403  ;;  %2535 = vst [vmem:[%s4374_s13 + $0x270] sm:$0xff] %v3402_v26  ;;  %v1749_v31 = vadd.f32 %v1748_v24, %v1700_v25 }
 0x2b3   : > { %2541 = vst [vmem:[%s4374_s13 + $0x2a0] sm:$0xff] %v3404_v29  ;;  %3405 = vtanh.f32 %v1845_v27 }
 0x2b4   : > { %3407 = vtanh.f32 %v1749_v31 }
 0x2b6   : > { %v1797_v38 = vpop.f32.mrf.mxu2  ;;  %v1846_v39 = vpop.f32.mrf.mxu3 }
 0x2b7   : > { %v1798_v40 = vadd.f32 %v1797_v38, %v4367_v44  ;;  %v1702_v41 = vpop.f32.mrf.mxu0  ;;  %v1751_v42 = vpop.f32.mrf.mxu1 }
 0x2b8   : > { %v1703_v43 = vadd.f32 %v1702_v41, %v4356_v36  ;;  %v3162_v41 = vld [vmem:[%s4990_s7 + $0x328] sm:$0xf] }
 0x2b9   : > { %v3406_v45 = vpop.eup %3405  ;;  %v1847_v48 = vadd.f32 %v1846_v39, %v1798_v40  ;;  %v3258_v39 = vld [vmem:[%s4990_s7 + $0x148] sm:$0xf0] }
 0x2ba   : > { %v3408_v49 = vpop.eup %3407  ;;  %2542 = vst [vmem:[%s4374_s13 + $0x2a8] sm:$0xff] %v3406_v45  ;;  %v1752_v50 = vadd.f32 %v1751_v42, %v1703_v43  ;;  %1897 = vmatmul.bf16.gmra.mxu0 %v4333_v30  ;;  %1946 = vmatmul.bf16.gmra.mxu1 %v4335_v12  ;;  %v3321_v42 = vld [vmem:[%s4990_s7 + $0x340] sm:$0xf0] }
 0x2bb   : > { %2548 = vst [vmem:[%s4374_s13 + $0x2d8] sm:$0xff] %v3408_v49  ;;  %3409 = vtanh.f32 %v1847_v48  ;;  %1995 = vmatmul.bf16.gmra.mxu2 %v4333_v30  ;;  %2044 = vmatmul.bf16.gmra.mxu3 %v4335_v12  ;;  %v3163_v43 = vor.u32 %v3321_v42, %v3162_v41 }
 0x2bc   : > { %3411 = vtanh.f32 %v1752_v50 }
 0x2bd   : > { %2296 = vmatpush.bf16.msra.mxu1 %v3163_v43  ;;  %3337 = vmatpush.bf16.msrb.mxu3 %v3163_v43 }
 0x2be   : > { %v1800_v51 = vpop.f32.mrf.mxu2  ;;  %v1849_v52 = vpop.f32.mrf.mxu3 }
 0x2bf   : > { %v1801_v53 = vadd.f32 %v1800_v51, %v4367_v44  ;;  %v1704_v54 = vpop.f32.mrf.mxu0  ;;  %v1753_v55 = vpop.f32.mrf.mxu1 }
 0x2c0   : > { %v1705_v56 = vadd.f32 %v1704_v54, %v4356_v36  ;;  %v2939_v36 = vor.u32 %v3265_v4, %v2938_v63 }
 0x2c1   : > { %v3410_v57 = vpop.eup %3409  ;;  %v1850_v60 = vadd.f32 %v1849_v52, %v1801_v53 }
 0x2c2   : > { %v3412_v61 = vpop.eup %3411  ;;  %2549 = vst [vmem:[%s4374_s13 + $0x2e0] sm:$0xff] %v3410_v57  ;;  %v1754_v62 = vadd.f32 %v1753_v55, %v1705_v56  ;;  %2247 = vmatpush.bf16.msra.mxu0 %v2939_v36 }
 0x2c3   : > { %2555 = vst [vmem:[%s4374_s13 + $0x310] sm:$0xff] %v3412_v61  ;;  %3413 = vtanh.f32 %v1850_v60 }
 0x2c4   : > { %3415 = vtanh.f32 %v1754_v62 }
 0x2c6   : > { %v1802_v11 = vpop.f32.mrf.mxu2  ;;  %v1851_v13 = vpop.f32.mrf.mxu3 }
 0x2c7   : > { %v1803_v14 = vadd.f32 %v1802_v11, %v4367_v44  ;;  %v1863_v15 = vpop.f32.mrf.mxu0  ;;  %v1912_v16 = vpop.f32.mrf.mxu1  ;;  %v4666_v44 = vperm.slane %v4344_v35, 3  ;;  %v2910_v35 = vld [vmem:[%s4990_s7 + $0x130] sm:$0xf]  ;;  %v2882_v11 = vld [vmem:[%s4990_s7 + $0xf8] sm:$0xf] }
 0x2c8   : > { %v1864_v17 = vadd.f32 %v1863_v15, %v4649_v5  ;;  %v2911_v40 = vor.u32 %v3258_v39, %v2910_v35  ;;  %v3134_v15 = vld [vmem:[%s4990_s7 + $0x2f0] sm:$0xf] }
 0x2c9   : > { %v3414_v18 = vpop.eup %3413  ;;  %v1852_v21 = vadd.f32 %v1851_v13, %v1803_v14  ;;  %v3251_v13 = vld [vmem:[%s4990_s7 + $0x110] sm:$0xf0] }
 0x2ca   : > { %v3416_v22 = vpop.eup %3415  ;;  %2556 = vst [vmem:[%s4374_s13 + $0x318] sm:$0xff] %v3414_v18  ;;  %v1913_v23 = vadd.f32 %v1912_v16, %v1864_v17  ;;  %2058 = vmatmul.bf16.vlgmr.msrb.gmra.mxu0 %v4069_v28  ;;  %2107 = vmatmul.bf16.vlgmr.msrb.gmra.mxu1 %v4071_v34  ;;  %v2883_v14 = vor.u32 %v3251_v13, %v2882_v11  ;;  %v3314_v16 = vld [vmem:[%s4990_s7 + $0x308] sm:$0xf0] }
 0x2cb   : > { %2562 = vst [vmem:[%s4374_s13 + $0x348] sm:$0xff] %v3416_v22  ;;  %3417 = vtanh.f32 %v1852_v21  ;;  %2156 = vmatmul.bf16.vlgmr.msra.gmra.mxu2 %v4069_v28  ;;  %2205 = vmatmul.bf16.vlgmr.msra.gmra.mxu3 %v4071_v34  ;;  %v3135_v17 = vor.u32 %v3314_v16, %v3134_v15 }
 0x2cc   : > { %3419 = vtanh.f32 %v1913_v23  ;;  %2248 = vmatpush.bf16.msra.mxu0 %v2911_v40 }
 0x2cd   : > { %2297 = vmatpush.bf16.msra.mxu1 %v3135_v17  ;;  %3338 = vmatpush.bf16.msrb.mxu3 %v3135_v17 }
 0x2ce   : > { %v1961_v24 = vpop.f32.mrf.mxu2  ;;  %v2010_v25 = vpop.f32.mrf.mxu3 }
 0x2cf   : > { %v1962_v26 = vadd.f32 %v1961_v24, %v4666_v44  ;;  %v1865_v27 = vpop.f32.mrf.mxu0  ;;  %v1914_v29 = vpop.f32.mrf.mxu1 }
 0x2d0   : > { %v1866_v31 = vadd.f32 %v1865_v27, %v4649_v5  ;;  %2249 = vmatpush.bf16.msra.mxu0 %v2883_v14 }
 0x2d1   : > { %v3418_v32 = vpop.eup %3417  ;;  %v2011_v33 = vadd.f32 %v2010_v25, %v1962_v26 }
 0x2d2   : > { %v3420_v37 = vpop.eup %3419  ;;  %2563 = vst [vmem:[%s4374_s13 + $0x350] sm:$0xff] %v3418_v32  ;;  %v1915_v38 = vadd.f32 %v1914_v29, %v1866_v31 }
 0x2d3   : > { %2458 = vst [vmem:[%s4374_s13 + $0x10] sm:$0xff] %v3420_v37  ;;  %3421 = vtanh.f32 %v2011_v33 }
 0x2d4   : > { %3423 = vtanh.f32 %v1915_v38 }
 0x2d6   : > { %v1963_v45 = vpop.f32.mrf.mxu2  ;;  %v2012_v48 = vpop.f32.mrf.mxu3 }
 0x2d7   : > { %v1964_v49 = vadd.f32 %v1963_v45, %v4666_v44  ;;  %v1868_v50 = vpop.f32.mrf.mxu0  ;;  %v1917_v51 = vpop.f32.mrf.mxu1  ;;  %v2854_v45 = vld [vmem:[%s4990_s7 + $0xc0] sm:$0xf] }
 0x2d8   : > { %v1869_v52 = vadd.f32 %v1868_v50, %v4649_v5  ;;  %v3106_v50 = vld [vmem:[%s4990_s7 + $0x2b8] sm:$0xf] }
 0x2d9   : > { %v3422_v53 = vpop.eup %3421  ;;  %v2013_v54 = vadd.f32 %v2012_v48, %v1964_v49  ;;  %v3244_v48 = vld [vmem:[%s4990_s7 + $0xd8] sm:$0xf0] }
 0x2da   : > { %v3424_v55 = vpop.eup %3423  ;;  %2459 = vst [vmem:[%s4374_s13 + $0x18] sm:$0xff] %v3422_v53  ;;  %v1918_v56 = vadd.f32 %v1917_v51, %v1869_v52  ;;  %2063 = vmatmul.bf16.gmra.mxu0 %v4093_v58  ;;  %2112 = vmatmul.bf16.gmra.mxu1 %v4095_v59  ;;  %v2855_v49 = vor.u32 %v3244_v48, %v2854_v45  ;;  %v3307_v51 = vld [vmem:[%s4990_s7 + $0x2d0] sm:$0xf0] }
 0x2db   : > { %2466 = vst [vmem:[%s4374_s13 + $0x48] sm:$0xff] %v3424_v55  ;;  %3425 = vtanh.f32 %v2013_v54  ;;  %2161 = vmatmul.bf16.gmra.mxu2 %v4093_v58  ;;  %2210 = vmatmul.bf16.gmra.mxu3 %v4095_v59  ;;  %v3107_v52 = vor.u32 %v3307_v51, %v3106_v50 }
 0x2dc   : > { %3427 = vtanh.f32 %v1918_v56  ;;  %2250 = vmatpush.bf16.msra.mxu0 %v2855_v49 }
 0x2dd   : > { %2298 = vmatpush.bf16.msra.mxu1 %v3107_v52  ;;  %3339 = vmatpush.bf16.msrb.mxu3 %v3107_v52 }
 0x2de   : > { %v1966_v57 = vpop.f32.mrf.mxu2  ;;  %v2015_v60 = vpop.f32.mrf.mxu3 }
 0x2df   : > { %v1967_v61 = vadd.f32 %v1966_v57, %v4666_v44  ;;  %v1870_v62 = vpop.f32.mrf.mxu0  ;;  %v1919_v63 = vpop.f32.mrf.mxu1 }
 0x2e0   : > { %v1871_v4 = vadd.f32 %v1870_v62, %v4649_v5 }
 0x2e1   : > { %v3426_v36 = vpop.eup %3425  ;;  %v2016_v6 = vadd.f32 %v2015_v60, %v1967_v61 }
 0x2e2   : > { %v3428_v7 = vpop.eup %3427  ;;  %2467 = vst [vmem:[%s4374_s13 + $0x50] sm:$0xff] %v3426_v36  ;;  %v1920_v10 = vadd.f32 %v1919_v63, %v1871_v4 }
 0x2e3   : > { %2473 = vst [vmem:[%s4374_s13 + $0x80] sm:$0xff] %v3428_v7  ;;  %3429 = vtanh.f32 %v2016_v6 }
 0x2e4   : > { %3431 = vtanh.f32 %v1920_v10 }
 0x2e6   : > { %v1968_v18 = vpop.f32.mrf.mxu2  ;;  %v2017_v21 = vpop.f32.mrf.mxu3 }
 0x2e7   : > { %v1969_v22 = vadd.f32 %v1968_v18, %v4666_v44  ;;  %v1873_v23 = vpop.f32.mrf.mxu0  ;;  %v1922_v24 = vpop.f32.mrf.mxu1  ;;  %v2826_v18 = vld [vmem:[%s4990_s7 + $0x88] sm:$0xf] }
 0x2e8   : > { %v1874_v25 = vadd.f32 %v1873_v23, %v4649_v5  ;;  %v3078_v23 = vld [vmem:[%s4990_s7 + $0x280] sm:$0xf] }
 0x2e9   : > { %v3430_v26 = vpop.eup %3429  ;;  %v2018_v27 = vadd.f32 %v2017_v21, %v1969_v22  ;;  %v3237_v21 = vld [vmem:[%s4990_s7 + $0xa0] sm:$0xf0] }
 0x2ea   : > { %v3432_v29 = vpop.eup %3431  ;;  %2474 = vst [vmem:[%s4374_s13 + $0x88] sm:$0xff] %v3430_v26  ;;  %v1923_v31 = vadd.f32 %v1922_v24, %v1874_v25  ;;  %2068 = vmatmul.bf16.gmra.mxu0 %v4117_v19  ;;  %2117 = vmatmul.bf16.gmra.mxu1 %v4119_v20  ;;  %v2827_v22 = vor.u32 %v3237_v21, %v2826_v18  ;;  %v3300_v24 = vld [vmem:[%s4990_s7 + $0x298] sm:$0xf0] }
 0x2eb   : > { %2480 = vst [vmem:[%s4374_s13 + $0xb8] sm:$0xff] %v3432_v29  ;;  %3433 = vtanh.f32 %v2018_v27  ;;  %2166 = vmatmul.bf16.gmra.mxu2 %v4117_v19  ;;  %2215 = vmatmul.bf16.gmra.mxu3 %v4119_v20  ;;  %v3079_v25 = vor.u32 %v3300_v24, %v3078_v23  ;;  %v3022_v24 = vld [vmem:[%s4990_s7 + $0x210] sm:$0xf] }
 0x2ec   : > { %3435 = vtanh.f32 %v1923_v31  ;;  %2251 = vmatpush.bf16.msra.mxu0 %v2827_v22 }
 0x2ed   : > { %2299 = vmatpush.bf16.msra.mxu1 %v3079_v25  ;;  %3340 = vmatpush.bf16.msrb.mxu3 %v3079_v25  ;;  %v3286_v25 = vld [vmem:[%s4990_s7 + $0x228] sm:$0xf0] }
 0x2ee   : > { %v1971_v32 = vpop.f32.mrf.mxu2  ;;  %v2020_v33 = vpop.f32.mrf.mxu3 }
 0x2ef   : > { %v1972_v37 = vadd.f32 %v1971_v32, %v4666_v44  ;;  %v1875_v38 = vpop.f32.mrf.mxu0  ;;  %v1924_v35 = vpop.f32.mrf.mxu1 }
 0x2f0   : > { %v1876_v39 = vadd.f32 %v1875_v38, %v4649_v5 }
 0x2f1   : > { %v3434_v40 = vpop.eup %3433  ;;  %v2021_v41 = vadd.f32 %v2020_v33, %v1972_v37 }
 0x2f2   : > { %v3436_v42 = vpop.eup %3435  ;;  %2481 = vst [vmem:[%s4374_s13 + $0xc0] sm:$0xff] %v3434_v40  ;;  %v1925_v43 = vadd.f32 %v1924_v35, %v1876_v39 }
 0x2f3   : > { %2487 = vst [vmem:[%s4374_s13 + $0xf0] sm:$0xff] %v3436_v42  ;;  %3437 = vtanh.f32 %v2021_v41 }
 0x2f4   : > { %3439 = vtanh.f32 %v1925_v43 }
 0x2f6   : > { %v1973_v53 = vpop.f32.mrf.mxu2  ;;  %v2022_v54 = vpop.f32.mrf.mxu3 }
 0x2f7   : > { %v1974_v55 = vadd.f32 %v1973_v53, %v4666_v44  ;;  %v1878_v56 = vpop.f32.mrf.mxu0  ;;  %v1927_v57 = vpop.f32.mrf.mxu1  ;;  %v2798_v53 = vld [vmem:[%s4990_s7 + $0x50] sm:$0xf] }
 0x2f8   : > { %v1879_v60 = vadd.f32 %v1878_v56, %v4649_v5  ;;  %v3050_v56 = vld [vmem:[%s4990_s7 + $0x248] sm:$0xf] }
 0x2f9   : > { %v3438_v61 = vpop.eup %3437  ;;  %v2023_v62 = vadd.f32 %v2022_v54, %v1974_v55  ;;  %v3230_v54 = vld [vmem:[%s4990_s7 + $0x68] sm:$0xf0] }
 0x2fa   : > { %v3440_v63 = vpop.eup %3439  ;;  %2488 = vst [vmem:[%s4374_s13 + $0xf8] sm:$0xff] %v3438_v61  ;;  %v1928_v4 = vadd.f32 %v1927_v57, %v1879_v60  ;;  %2073 = vmatmul.bf16.gmra.mxu0 %v4141_v46  ;;  %2122 = vmatmul.bf16.gmra.mxu1 %v4143_v47  ;;  %v2799_v55 = vor.u32 %v3230_v54, %v2798_v53  ;;  %v3293_v57 = vld [vmem:[%s4990_s7 + $0x260] sm:$0xf0] }
 0x2fb   : > { %2494 = vst [vmem:[%s4374_s13 + $0x128] sm:$0xff] %v3440_v63  ;;  %3441 = vtanh.f32 %v2023_v62  ;;  %2171 = vmatmul.bf16.gmra.mxu2 %v4141_v46  ;;  %2220 = vmatmul.bf16.gmra.mxu3 %v4143_v47  ;;  %v3051_v60 = vor.u32 %v3293_v57, %v3050_v56 }
 0x2fc   : > { %3443 = vtanh.f32 %v1928_v4  ;;  %2252 = vmatpush.bf16.msra.mxu0 %v2799_v55 }
 0x2fd   : > { %2300 = vmatpush.bf16.msra.mxu1 %v3051_v60  ;;  %3341 = vmatpush.bf16.msrb.mxu3 %v3051_v60 }
 0x2fe   : > { %v1976_v36 = vpop.f32.mrf.mxu2  ;;  %v2025_v6 = vpop.f32.mrf.mxu3 }
 0x2ff   : > { %v1977_v7 = vadd.f32 %v1976_v36, %v4666_v44  ;;  %v1880_v10 = vpop.f32.mrf.mxu0  ;;  %v1929_v11 = vpop.f32.mrf.mxu1 }
 0x300   : > { %v1881_v13 = vadd.f32 %v1880_v10, %v4649_v5 }
 0x301   : > { %v3442_v14 = vpop.eup %3441  ;;  %v2026_v15 = vadd.f32 %v2025_v6, %v1977_v7 }
 0x302   : > { %v3444_v16 = vpop.eup %3443  ;;  %2495 = vst [vmem:[%s4374_s13 + $0x130] sm:$0xff] %v3442_v14  ;;  %v1930_v17 = vadd.f32 %v1929_v11, %v1881_v13 }
 0x303   : > { %2501 = vst [vmem:[%s4374_s13 + $0x160] sm:$0xff] %v3444_v16  ;;  %3445 = vtanh.f32 %v2026_v15 }
 0x304   : > { %3447 = vtanh.f32 %v1930_v17 }
 0x306   : > { %v1978_v26 = vpop.f32.mrf.mxu2  ;;  %v2027_v27 = vpop.f32.mrf.mxu3 }
 0x307   : > { %v1979_v29 = vadd.f32 %v1978_v26, %v4666_v44  ;;  %v1883_v31 = vpop.f32.mrf.mxu0  ;;  %v1932_v32 = vpop.f32.mrf.mxu1 }
 0x308   : > { %v1884_v33 = vadd.f32 %v1883_v31, %v4649_v5  ;;  %v2770_v31 = vld [vmem:[%s4990_s7 + $0x18] sm:$0xf] }
 0x309   : > { %v3446_v37 = vpop.eup %3445  ;;  %v2028_v38 = vadd.f32 %v2027_v27, %v1979_v29  ;;  %v3023_v29 = vor.u32 %v3286_v25, %v3022_v24 }
 0x30a   : > { %v3448_v35 = vpop.eup %3447  ;;  %2502 = vst [vmem:[%s4374_s13 + $0x168] sm:$0xff] %v3446_v37  ;;  %v1933_v39 = vadd.f32 %v1932_v32, %v1884_v33  ;;  %2078 = vmatmul.bf16.gmra.mxu0 %v4165_v8  ;;  %2127 = vmatmul.bf16.gmra.mxu1 %v4167_v9  ;;  %v3223_v32 = vld [vmem:[%s4990_s7 + $0x30] sm:$0xf0]  ;;  %v2994_v37 = vld [vmem:[%s4990_s7 + $0x1d8] sm:$0xf] }
 0x30b   : > { %2508 = vst [vmem:[%s4374_s13 + $0x198] sm:$0xff] %v3448_v35  ;;  %3449 = vtanh.f32 %v2028_v38  ;;  %2176 = vmatmul.bf16.gmra.mxu2 %v4165_v8  ;;  %2225 = vmatmul.bf16.gmra.mxu3 %v4167_v9  ;;  %v2771_v33 = vor.u32 %v3223_v32, %v2770_v31  ;;  %v3279_v38 = vld [vmem:[%s4990_s7 + $0x1f0] sm:$0xf0]  ;;  %v4837_v31 = vld [vmem:[%s4991_s8] sm:$0x7f] }
 0x30c   : > { %3451 = vtanh.f32 %v1933_v39  ;;  %2301 = vmatpush.bf16.msra.mxu1 %v3023_v29  ;;  %3342 = vmatpush.bf16.msrb.mxu3 %v3023_v29  ;;  %v4840_v32 = vperm.slane %v4837_v31, 4 }
 0x30d   : > { %2253 = vmatpush.bf16.msra.mxu0 %v2771_v33 }
 0x30e   : > { %v1981_v40 = vpop.f32.mrf.mxu2  ;;  %v2030_v41 = vpop.f32.mrf.mxu3 }
 0x30f   : > { %v1982_v42 = vadd.f32 %v1981_v40, %v4666_v44  ;;  %v1885_v43 = vpop.f32.mrf.mxu0  ;;  %v1934_v45 = vpop.f32.mrf.mxu1  ;;  %v2995_v40 = vor.u32 %v3279_v38, %v2994_v37 }
 0x310   : > { %v1886_v48 = vadd.f32 %v1885_v43, %v4649_v5 }
 0x311   : > { %v3450_v49 = vpop.eup %3449  ;;  %v2031_v50 = vadd.f32 %v2030_v41, %v1982_v42  ;;  %2302 = vmatpush.bf16.msra.mxu1 %v2995_v40  ;;  %3343 = vmatpush.bf16.msrb.mxu3 %v2995_v40 }
 0x312   : > { %v3452_v51 = vpop.eup %3451  ;;  %2509 = vst [vmem:[%s4374_s13 + $0x1a0] sm:$0xff] %v3450_v49  ;;  %v1935_v52 = vadd.f32 %v1934_v45, %v1886_v48 }
 0x313   : > { %2515 = vst [vmem:[%s4374_s13 + $0x1d0] sm:$0xff] %v3452_v51  ;;  %3453 = vtanh.f32 %v2031_v50 }
 0x314   : > { %3455 = vtanh.f32 %v1935_v52 }
 0x316   : > { %v1983_v61 = vpop.f32.mrf.mxu2  ;;  %v2032_v62 = vpop.f32.mrf.mxu3 }
 0x317   : > { %v1984_v63 = vadd.f32 %v1983_v61, %v4666_v44  ;;  %v1888_v4 = vpop.f32.mrf.mxu0  ;;  %v1937_v36 = vpop.f32.mrf.mxu1 }
 0x318   : > { %v1889_v6 = vadd.f32 %v1888_v4, %v4649_v5 }
 0x319   : > { %v3454_v7 = vpop.eup %3453  ;;  %v2033_v10 = vadd.f32 %v2032_v62, %v1984_v63 }
 0x31a   : > { %v3456_v11 = vpop.eup %3455  ;;  %2516 = vst [vmem:[%s4374_s13 + $0x1d8] sm:$0xff] %v3454_v7  ;;  %v1938_v13 = vadd.f32 %v1937_v36, %v1889_v6  ;;  %2083 = vmatmul.bf16.gmra.mxu0 %v4237_v1  ;;  %2132 = vmatmul.bf16.gmra.mxu1 %v4239_v2 }
 0x31b   : > { %2522 = vst [vmem:[%s4374_s13 + $0x208] sm:$0xff] %v3456_v11  ;;  %3457 = vtanh.f32 %v2033_v10  ;;  %2181 = vmatmul.bf16.gmra.mxu2 %v4237_v1  ;;  %2230 = vmatmul.bf16.gmra.mxu3 %v4239_v2 }
 0x31c   : > { %3459 = vtanh.f32 %v1938_v13 }
 0x31e   : > { %v1986_v14 = vpop.f32.mrf.mxu2  ;;  %v2035_v15 = vpop.f32.mrf.mxu3 }
 0x31f   : > { %v1987_v16 = vadd.f32 %v1986_v14, %v4666_v44  ;;  %v1890_v17 = vpop.f32.mrf.mxu0  ;;  %v1939_v18 = vpop.f32.mrf.mxu1 }
 0x320   : > { %v1891_v21 = vadd.f32 %v1890_v17, %v4649_v5 }
 0x321   : > { %v3458_v22 = vpop.eup %3457  ;;  %v2036_v23 = vadd.f32 %v2035_v15, %v1987_v16 }
 0x322   : > { %v3460_v26 = vpop.eup %3459  ;;  %2523 = vst [vmem:[%s4374_s13 + $0x210] sm:$0xff] %v3458_v22  ;;  %v1940_v27 = vadd.f32 %v1939_v18, %v1891_v21 }
 0x323   : > { %2529 = vst [vmem:[%s4374_s13 + $0x240] sm:$0xff] %v3460_v26  ;;  %3461 = vtanh.f32 %v2036_v23 }
 0x324   : > { %3463 = vtanh.f32 %v1940_v27 }
 0x326   : > { %v1988_v35 = vpop.f32.mrf.mxu2  ;;  %v2037_v39 = vpop.f32.mrf.mxu3 }
 0x327   : > { %v1989_v41 = vadd.f32 %v1988_v35, %v4666_v44  ;;  %v1893_v42 = vpop.f32.mrf.mxu0  ;;  %v1942_v43 = vpop.f32.mrf.mxu1 }
 0x328   : > { %v1894_v45 = vadd.f32 %v1893_v42, %v4649_v5 }
 0x329   : > { %v3462_v48 = vpop.eup %3461  ;;  %v2038_v49 = vadd.f32 %v2037_v39, %v1989_v41 }
 0x32a   : > { %v3464_v50 = vpop.eup %3463  ;;  %2530 = vst [vmem:[%s4374_s13 + $0x248] sm:$0xff] %v3462_v48  ;;  %v1943_v51 = vadd.f32 %v1942_v43, %v1894_v45  ;;  %2088 = vmatmul.bf16.gmra.mxu0 %v4315_v0  ;;  %2137 = vmatmul.bf16.gmra.mxu1 %v4317_v3 }
 0x32b   : > { %2536 = vst [vmem:[%s4374_s13 + $0x278] sm:$0xff] %v3464_v50  ;;  %3465 = vtanh.f32 %v2038_v49  ;;  %2186 = vmatmul.bf16.gmra.mxu2 %v4315_v0  ;;  %2235 = vmatmul.bf16.gmra.mxu3 %v4317_v3 }
 0x32c   : > { %3467 = vtanh.f32 %v1943_v51 }
 0x32e   : > { %v1991_v52 = vpop.f32.mrf.mxu2  ;;  %v2040_v53 = vpop.f32.mrf.mxu3 }
 0x32f   : > { %v1992_v54 = vadd.f32 %v1991_v52, %v4666_v44  ;;  %v1895_v55 = vpop.f32.mrf.mxu0  ;;  %v1944_v56 = vpop.f32.mrf.mxu1 }
 0x330   : > { %v1896_v57 = vadd.f32 %v1895_v55, %v4649_v5 }
 0x331   : > { %v3466_v60 = vpop.eup %3465  ;;  %v2041_v61 = vadd.f32 %v2040_v53, %v1992_v54 }
 0x332   : > { %v3468_v62 = vpop.eup %3467  ;;  %2537 = vst [vmem:[%s4374_s13 + $0x280] sm:$0xff] %v3466_v60  ;;  %v1945_v63 = vadd.f32 %v1944_v56, %v1896_v57 }
 0x333   : > { %2543 = vst [vmem:[%s4374_s13 + $0x2b0] sm:$0xff] %v3468_v62  ;;  %3469 = vtanh.f32 %v2041_v61 }
 0x334   : > { %3471 = vtanh.f32 %v1945_v63 }
 0x336   : > { %v1993_v4 = vpop.f32.mrf.mxu2  ;;  %v2042_v36 = vpop.f32.mrf.mxu3 }
 0x337   : > { %v1994_v6 = vadd.f32 %v1993_v4, %v4666_v44  ;;  %v1898_v7 = vpop.f32.mrf.mxu0  ;;  %v1947_v10 = vpop.f32.mrf.mxu1 }
 0x338   : > { %v1899_v11 = vadd.f32 %v1898_v7, %v4649_v5 }
 0x339   : > { %v3470_v13 = vpop.eup %3469  ;;  %v2043_v14 = vadd.f32 %v2042_v36, %v1994_v6 }
 0x33a   : > { %v3472_v15 = vpop.eup %3471  ;;  %2544 = vst [vmem:[%s4374_s13 + $0x2b8] sm:$0xff] %v3470_v13  ;;  %v1948_v16 = vadd.f32 %v1947_v10, %v1899_v11  ;;  %2093 = vmatmul.bf16.gmra.mxu0 %v4333_v30  ;;  %2142 = vmatmul.bf16.gmra.mxu1 %v4335_v12 }
 0x33b   : > { %2550 = vst [vmem:[%s4374_s13 + $0x2e8] sm:$0xff] %v3472_v15  ;;  %3473 = vtanh.f32 %v2043_v14  ;;  %2191 = vmatmul.bf16.gmra.mxu2 %v4333_v30  ;;  %2240 = vmatmul.bf16.gmra.mxu3 %v4335_v12 }
 0x33c   : > { %3475 = vtanh.f32 %v1948_v16 }
 0x33e   : > { %v1996_v17 = vpop.f32.mrf.mxu2  ;;  %v2045_v18 = vpop.f32.mrf.mxu3 }
 0x33f   : > { %v1997_v21 = vadd.f32 %v1996_v17, %v4666_v44  ;;  %v1900_v22 = vpop.f32.mrf.mxu0  ;;  %v1949_v23 = vpop.f32.mrf.mxu1 }
 0x340   : > { %v1901_v24 = vadd.f32 %v1900_v22, %v4649_v5 }
 0x341   : > { %v3474_v25 = vpop.eup %3473  ;;  %v2046_v26 = vadd.f32 %v2045_v18, %v1997_v21 }
 0x342   : > { %v3476_v27 = vpop.eup %3475  ;;  %2551 = vst [vmem:[%s4374_s13 + $0x2f0] sm:$0xff] %v3474_v25  ;;  %v1950_v29 = vadd.f32 %v1949_v23, %v1901_v24 }
 0x343   : > { %2557 = vst [vmem:[%s4374_s13 + $0x320] sm:$0xff] %v3476_v27  ;;  %3477 = vtanh.f32 %v2046_v26 }
 0x344   : > { %3479 = vtanh.f32 %v1950_v29 }
 0x346   : > { %v1998_v33 = vpop.f32.mrf.mxu2  ;;  %v2047_v5 = vpop.f32.mrf.mxu3 }
 0x347   : > { %v1999_v37 = vadd.f32 %v1998_v33, %v4666_v44  ;;  %v2059_v38 = vpop.f32.mrf.mxu0  ;;  %v2108_v35 = vpop.f32.mrf.mxu1  ;;  %v4850_v44 = vperm.slane %v4837_v31, 5 }
 0x348   : > { %v2060_v39 = vadd.f32 %v2059_v38, %v4840_v32 }
 0x349   : > { %v3478_v40 = vpop.eup %3477  ;;  %v2048_v41 = vadd.f32 %v2047_v5, %v1999_v37 }
 0x34a   : > { %v3480_v42 = vpop.eup %3479  ;;  %2558 = vst [vmem:[%s4374_s13 + $0x328] sm:$0xff] %v3478_v40  ;;  %v2109_v43 = vadd.f32 %v2108_v35, %v2060_v39  ;;  %2254 = vmatmul.bf16.vlgmr.msra.gmra.mxu0 %v4069_v28  ;;  %2303 = vmatmul.bf16.vlgmr.msra.gmra.mxu1 %v4071_v34 }
 0x34b   : > { %2564 = vst [vmem:[%s4374_s13 + $0x358] sm:$0xff] %v3480_v42  ;;  %3481 = vtanh.f32 %v2048_v41  ;;  %2338 = vmatmul.bf16.vlgmr.msrb.gmra.mxu3 %v4335_v12 }
 0x34c   : > { %3483 = vtanh.f32 %v2109_v43 }
 0x34e   : > { %v2157_v45 = vpop.f32.mrf.mxu2  ;;  %v2206_v48 = vpop.f32.mrf.mxu3 }
 0x34f   : > { %v2158_v49 = vadd.f32 %v2157_v45, %v4850_v44  ;;  %v2061_v50 = vpop.f32.mrf.mxu0  ;;  %v2110_v51 = vpop.f32.mrf.mxu1 }
 0x350   : > { %v2062_v28 = vadd.f32 %v2061_v50, %v4840_v32 }
 0x351   : > { %v3482_v52 = vpop.eup %3481  ;;  %v2207_v53 = vadd.f32 %v2206_v48, %v2158_v49 }
 0x352   : > { %v3484_v34 = vpop.eup %3483  ;;  %2565 = vst [vmem:[%s4374_s13 + $0x360] sm:$0xff] %v3482_v52  ;;  %v2111_v54 = vadd.f32 %v2110_v51, %v2062_v28 }
 0x353   : > { %2460 = vst [vmem:[%s4374_s13 + $0x20] sm:$0xff] %v3484_v34  ;;  %3485 = vtanh.f32 %v2207_v53 }
 0x354   : > { %3487 = vtanh.f32 %v2111_v54 }
 0x356   : > { %v2159_v12 = vpop.f32.mrf.mxu2  ;;  %v2208_v55 = vpop.f32.mrf.mxu3 }
 0x357   : > { %v2160_v56 = vadd.f32 %v2159_v12, %v4850_v44  ;;  %v2064_v57 = vpop.f32.mrf.mxu0  ;;  %v2113_v60 = vpop.f32.mrf.mxu1 }
 0x358   : > { %v2065_v61 = vadd.f32 %v2064_v57, %v4840_v32 }
 0x359   : > { %v3486_v62 = vpop.eup %3485  ;;  %v2209_v63 = vadd.f32 %v2208_v55, %v2160_v56 }
 0x35a   : > { %v3488_v4 = vpop.eup %3487  ;;  %2461 = vst [vmem:[%s4374_s13 + $0x28] sm:$0xff] %v3486_v62  ;;  %v2114_v36 = vadd.f32 %v2113_v60, %v2065_v61  ;;  %2259 = vmatmul.bf16.gmra.mxu0 %v4093_v58  ;;  %2308 = vmatmul.bf16.gmra.mxu1 %v4095_v59 }
 0x35b   : > { %2468 = vst [vmem:[%s4374_s13 + $0x58] sm:$0xff] %v3488_v4  ;;  %3489 = vtanh.f32 %v2209_v63 }
 0x35c   : > { %3491 = vtanh.f32 %v2114_v36 }
 0x35e   : > { %v2162_v6 = vpop.f32.mrf.mxu2  ;;  %v2211_v7 = vpop.f32.mrf.mxu3 }
 0x35f   : > { %v2163_v10 = vadd.f32 %v2162_v6, %v4850_v44  ;;  %v2066_v11 = vpop.f32.mrf.mxu0  ;;  %v2115_v13 = vpop.f32.mrf.mxu1 }
 0x360   : > { %v2067_v14 = vadd.f32 %v2066_v11, %v4840_v32 }
 0x361   : > { %v3490_v15 = vpop.eup %3489  ;;  %v2212_v16 = vadd.f32 %v2211_v7, %v2163_v10 }
 0x362   : > { %v3492_v17 = vpop.eup %3491  ;;  %2469 = vst [vmem:[%s4374_s13 + $0x60] sm:$0xff] %v3490_v15  ;;  %v2116_v58 = vadd.f32 %v2115_v13, %v2067_v14 }
 0x363   : > { %2475 = vst [vmem:[%s4374_s13 + $0x90] sm:$0xff] %v3492_v17  ;;  %3493 = vtanh.f32 %v2212_v16 }
 0x364   : > { %3495 = vtanh.f32 %v2116_v58 }
 0x366   : > { %v2164_v59 = vpop.f32.mrf.mxu2  ;;  %v2213_v18 = vpop.f32.mrf.mxu3 }
 0x367   : > { %v2165_v21 = vadd.f32 %v2164_v59, %v4850_v44  ;;  %v2069_v22 = vpop.f32.mrf.mxu0  ;;  %v2118_v23 = vpop.f32.mrf.mxu1 }
 0x368   : > { %v2070_v24 = vadd.f32 %v2069_v22, %v4840_v32 }
 0x369   : > { %v3494_v25 = vpop.eup %3493  ;;  %v2214_v26 = vadd.f32 %v2213_v18, %v2165_v21 }
 0x36a   : > { %v3496_v27 = vpop.eup %3495  ;;  %2476 = vst [vmem:[%s4374_s13 + $0x98] sm:$0xff] %v3494_v25  ;;  %v2119_v29 = vadd.f32 %v2118_v23, %v2070_v24  ;;  %2264 = vmatmul.bf16.gmra.mxu0 %v4117_v19  ;;  %2313 = vmatmul.bf16.gmra.mxu1 %v4119_v20 }
 0x36b   : > { %2482 = vst [vmem:[%s4374_s13 + $0xc8] sm:$0xff] %v3496_v27  ;;  %3497 = vtanh.f32 %v2214_v26 }
 0x36c   : > { %3499 = vtanh.f32 %v2119_v29 }
 0x36e   : > { %v2167_v33 = vpop.f32.mrf.mxu2  ;;  %v2216_v5 = vpop.f32.mrf.mxu3 }
 0x36f   : > { %v2168_v37 = vadd.f32 %v2167_v33, %v4850_v44  ;;  %v2071_v38 = vpop.f32.mrf.mxu0  ;;  %v2120_v35 = vpop.f32.mrf.mxu1 }
 0x370   : > { %v2072_v39 = vadd.f32 %v2071_v38, %v4840_v32 }
 0x371   : > { %v3498_v40 = vpop.eup %3497  ;;  %v2217_v41 = vadd.f32 %v2216_v5, %v2168_v37 }
 0x372   : > { %v3500_v42 = vpop.eup %3499  ;;  %2483 = vst [vmem:[%s4374_s13 + $0xd0] sm:$0xff] %v3498_v40  ;;  %v2121_v19 = vadd.f32 %v2120_v35, %v2072_v39 }
 0x373   : > { %2489 = vst [vmem:[%s4374_s13 + $0x100] sm:$0xff] %v3500_v42  ;;  %3501 = vtanh.f32 %v2217_v41 }
 0x374   : > { %3503 = vtanh.f32 %v2121_v19 }
 0x376   : > { %v2169_v20 = vpop.f32.mrf.mxu2  ;;  %v2218_v43 = vpop.f32.mrf.mxu3 }
 0x377   : > { %v2170_v45 = vadd.f32 %v2169_v20, %v4850_v44  ;;  %v2074_v48 = vpop.f32.mrf.mxu0  ;;  %v2123_v49 = vpop.f32.mrf.mxu1 }
 0x378   : > { %v2075_v50 = vadd.f32 %v2074_v48, %v4840_v32 }
 0x379   : > { %v3502_v51 = vpop.eup %3501  ;;  %v2219_v28 = vadd.f32 %v2218_v43, %v2170_v45 }
 0x37a   : > { %v3504_v52 = vpop.eup %3503  ;;  %2490 = vst [vmem:[%s4374_s13 + $0x108] sm:$0xff] %v3502_v51  ;;  %v2124_v53 = vadd.f32 %v2123_v49, %v2075_v50  ;;  %2269 = vmatmul.bf16.gmra.mxu0 %v4141_v46  ;;  %2318 = vmatmul.bf16.gmra.mxu1 %v4143_v47 }
 0x37b   : > { %2496 = vst [vmem:[%s4374_s13 + $0x138] sm:$0xff] %v3504_v52  ;;  %3505 = vtanh.f32 %v2219_v28 }
 0x37c   : > { %3507 = vtanh.f32 %v2124_v53 }
 0x37e   : > { %v2172_v34 = vpop.f32.mrf.mxu2  ;;  %v2221_v54 = vpop.f32.mrf.mxu3 }
 0x37f   : > { %v2173_v12 = vadd.f32 %v2172_v34, %v4850_v44  ;;  %v2076_v55 = vpop.f32.mrf.mxu0  ;;  %v2125_v56 = vpop.f32.mrf.mxu1 }
 0x380   : > { %v2077_v57 = vadd.f32 %v2076_v55, %v4840_v32 }
 0x381   : > { %v3506_v60 = vpop.eup %3505  ;;  %v2222_v61 = vadd.f32 %v2221_v54, %v2173_v12 }
 0x382   : > { %v3508_v62 = vpop.eup %3507  ;;  %2497 = vst [vmem:[%s4374_s13 + $0x140] sm:$0xff] %v3506_v60  ;;  %v2126_v46 = vadd.f32 %v2125_v56, %v2077_v57 }
 0x383   : > { %2503 = vst [vmem:[%s4374_s13 + $0x170] sm:$0xff] %v3508_v62  ;;  %3509 = vtanh.f32 %v2222_v61 }
 0x384   : > { %3511 = vtanh.f32 %v2126_v46 }
 0x386   : > { %v2174_v47 = vpop.f32.mrf.mxu2  ;;  %v2223_v63 = vpop.f32.mrf.mxu3 }
 0x387   : > { %v2175_v4 = vadd.f32 %v2174_v47, %v4850_v44  ;;  %v2079_v36 = vpop.f32.mrf.mxu0  ;;  %v2128_v6 = vpop.f32.mrf.mxu1 }
 0x388   : > { %v2080_v7 = vadd.f32 %v2079_v36, %v4840_v32 }
 0x389   : > { %v3510_v10 = vpop.eup %3509  ;;  %v2224_v11 = vadd.f32 %v2223_v63, %v2175_v4 }
 0x38a   : > { %v3512_v13 = vpop.eup %3511  ;;  %2504 = vst [vmem:[%s4374_s13 + $0x178] sm:$0xff] %v3510_v10  ;;  %v2129_v14 = vadd.f32 %v2128_v6, %v2080_v7  ;;  %2274 = vmatmul.bf16.gmra.mxu0 %v4165_v8  ;;  %2323 = vmatmul.bf16.gmra.mxu1 %v4167_v9 }
 0x38b   : > { %2510 = vst [vmem:[%s4374_s13 + $0x1a8] sm:$0xff] %v3512_v13  ;;  %3513 = vtanh.f32 %v2224_v11 }
 0x38c   : > { %3515 = vtanh.f32 %v2129_v14 }
 0x38e   : > { %v2177_v15 = vpop.f32.mrf.mxu2  ;;  %v2226_v16 = vpop.f32.mrf.mxu3 }
 0x38f   : > { %v2178_v17 = vadd.f32 %v2177_v15, %v4850_v44  ;;  %v2081_v58 = vpop.f32.mrf.mxu0  ;;  %v2130_v59 = vpop.f32.mrf.mxu1 }
 0x390   : > { %v2082_v18 = vadd.f32 %v2081_v58, %v4840_v32 }
 0x391   : > { %v3514_v21 = vpop.eup %3513  ;;  %v2227_v22 = vadd.f32 %v2226_v16, %v2178_v17 }
 0x392   : > { %v3516_v23 = vpop.eup %3515  ;;  %2511 = vst [vmem:[%s4374_s13 + $0x1b0] sm:$0xff] %v3514_v21  ;;  %v2131_v8 = vadd.f32 %v2130_v59, %v2082_v18 }
 0x393   : > { %2517 = vst [vmem:[%s4374_s13 + $0x1e0] sm:$0xff] %v3516_v23  ;;  %3517 = vtanh.f32 %v2227_v22 }
 0x394   : > { %3519 = vtanh.f32 %v2131_v8 }
 0x396   : > { %v2179_v9 = vpop.f32.mrf.mxu2  ;;  %v2228_v24 = vpop.f32.mrf.mxu3 }
 0x397   : > { %v2180_v25 = vadd.f32 %v2179_v9, %v4850_v44  ;;  %v2084_v26 = vpop.f32.mrf.mxu0  ;;  %v2133_v27 = vpop.f32.mrf.mxu1 }
 0x398   : > { %v2085_v29 = vadd.f32 %v2084_v26, %v4840_v32 }
 0x399   : > { %v3518_v33 = vpop.eup %3517  ;;  %v2229_v5 = vadd.f32 %v2228_v24, %v2180_v25 }
 0x39a   : > { %v3520_v37 = vpop.eup %3519  ;;  %2518 = vst [vmem:[%s4374_s13 + $0x1e8] sm:$0xff] %v3518_v33  ;;  %v2134_v38 = vadd.f32 %v2133_v27, %v2085_v29  ;;  %2279 = vmatmul.bf16.gmra.mxu0 %v4237_v1  ;;  %2328 = vmatmul.bf16.gmra.mxu1 %v4239_v2 }
 0x39b   : > { %2524 = vst [vmem:[%s4374_s13 + $0x218] sm:$0xff] %v3520_v37  ;;  %3521 = vtanh.f32 %v2229_v5 }
 0x39c   : > { %3523 = vtanh.f32 %v2134_v38 }
 0x39e   : > { %v2182_v35 = vpop.f32.mrf.mxu2  ;;  %v2231_v39 = vpop.f32.mrf.mxu3 }
 0x39f   : > { %v2183_v40 = vadd.f32 %v2182_v35, %v4850_v44  ;;  %v2086_v41 = vpop.f32.mrf.mxu0  ;;  %v2135_v42 = vpop.f32.mrf.mxu1 }
 0x3a0   : > { %v2087_v19 = vadd.f32 %v2086_v41, %v4840_v32 }
 0x3a1   : > { %v3522_v20 = vpop.eup %3521  ;;  %v2232_v43 = vadd.f32 %v2231_v39, %v2183_v40 }
 0x3a2   : > { %v3524_v45 = vpop.eup %3523  ;;  %2525 = vst [vmem:[%s4374_s13 + $0x220] sm:$0xff] %v3522_v20  ;;  %v2136_v1 = vadd.f32 %v2135_v42, %v2087_v19 }
 0x3a3   : > { %2531 = vst [vmem:[%s4374_s13 + $0x250] sm:$0xff] %v3524_v45  ;;  %3525 = vtanh.f32 %v2232_v43 }
 0x3a4   : > { %3527 = vtanh.f32 %v2136_v1 }
 0x3a6   : > { %v2184_v2 = vpop.f32.mrf.mxu2  ;;  %v2233_v48 = vpop.f32.mrf.mxu3 }
 0x3a7   : > { %v2185_v49 = vadd.f32 %v2184_v2, %v4850_v44  ;;  %v2089_v50 = vpop.f32.mrf.mxu0  ;;  %v2138_v51 = vpop.f32.mrf.mxu1 }
 0x3a8   : > { %v2090_v28 = vadd.f32 %v2089_v50, %v4840_v32 }
 0x3a9   : > { %v3526_v52 = vpop.eup %3525  ;;  %v2234_v53 = vadd.f32 %v2233_v48, %v2185_v49 }
 0x3aa   : > { %v3528_v34 = vpop.eup %3527  ;;  %2532 = vst [vmem:[%s4374_s13 + $0x258] sm:$0xff] %v3526_v52  ;;  %v2139_v54 = vadd.f32 %v2138_v51, %v2090_v28  ;;  %2284 = vmatmul.bf16.gmra.mxu0 %v4315_v0  ;;  %2333 = vmatmul.bf16.gmra.mxu1 %v4317_v3 }
 0x3ab   : > { %2538 = vst [vmem:[%s4374_s13 + $0x288] sm:$0xff] %v3528_v34  ;;  %3529 = vtanh.f32 %v2234_v53 }
 0x3ac   : > { %3531 = vtanh.f32 %v2139_v54 }
 0x3ae   : > { %v2187_v12 = vpop.f32.mrf.mxu2  ;;  %v2236_v55 = vpop.f32.mrf.mxu3 }
 0x3af   : > { %v2188_v56 = vadd.f32 %v2187_v12, %v4850_v44  ;;  %v2091_v57 = vpop.f32.mrf.mxu0  ;;  %v2140_v60 = vpop.f32.mrf.mxu1 }
 0x3b0   : > { %v2092_v61 = vadd.f32 %v2091_v57, %v4840_v32 }
 0x3b1   : > { %v3530_v62 = vpop.eup %3529  ;;  %v2237_v46 = vadd.f32 %v2236_v55, %v2188_v56 }
 0x3b2   : > { %v3532_v47 = vpop.eup %3531  ;;  %2539 = vst [vmem:[%s4374_s13 + $0x290] sm:$0xff] %v3530_v62  ;;  %v2141_v0 = vadd.f32 %v2140_v60, %v2092_v61 }
 0x3b3   : > { %2545 = vst [vmem:[%s4374_s13 + $0x2c0] sm:$0xff] %v3532_v47  ;;  %3533 = vtanh.f32 %v2237_v46 }
 0x3b4   : > { %3535 = vtanh.f32 %v2141_v0 }
 0x3b6   : > { %v2189_v3 = vpop.f32.mrf.mxu2  ;;  %v2238_v63 = vpop.f32.mrf.mxu3 }
 0x3b7   : > { %v2190_v4 = vadd.f32 %v2189_v3, %v4850_v44  ;;  %v2094_v36 = vpop.f32.mrf.mxu0  ;;  %v2143_v6 = vpop.f32.mrf.mxu1 }
 0x3b8   : > { %v2095_v7 = vadd.f32 %v2094_v36, %v4840_v32 }
 0x3b9   : > { %v3534_v10 = vpop.eup %3533  ;;  %v2239_v11 = vadd.f32 %v2238_v63, %v2190_v4 }
 0x3ba   : > { %v3536_v13 = vpop.eup %3535  ;;  %2546 = vst [vmem:[%s4374_s13 + $0x2c8] sm:$0xff] %v3534_v10  ;;  %v2144_v14 = vadd.f32 %v2143_v6, %v2095_v7  ;;  %2289 = vmatmul.bf16.gmra.mxu0 %v4333_v30  ;;  %v4926_v30 = vperm.slane %v4837_v31, 6 }
 0x3bb   : > { %2552 = vst [vmem:[%s4374_s13 + $0x2f8] sm:$0xff] %v3536_v13  ;;  %3537 = vtanh.f32 %v2239_v11 }
 0x3bc   : > { %3539 = vtanh.f32 %v2144_v14 }
 0x3be   : > { %v2192_v15 = vpop.f32.mrf.mxu2  ;;  %v2241_v16 = vpop.f32.mrf.mxu3 }
 0x3bf   : > { %v2193_v17 = vadd.f32 %v2192_v15, %v4850_v44  ;;  %v2096_v58 = vpop.f32.mrf.mxu0  ;;  %v2145_v59 = vpop.f32.mrf.mxu1 }
 0x3c0   : > { %v2097_v18 = vadd.f32 %v2096_v58, %v4840_v32 }
 0x3c1   : > { %v3538_v21 = vpop.eup %3537  ;;  %v2242_v22 = vadd.f32 %v2241_v16, %v2193_v17 }
 0x3c2   : > { %v3540_v23 = vpop.eup %3539  ;;  %2553 = vst [vmem:[%s4374_s13 + $0x300] sm:$0xff] %v3538_v21  ;;  %v2146_v8 = vadd.f32 %v2145_v59, %v2097_v18 }
 0x3c3   : > { %2559 = vst [vmem:[%s4374_s13 + $0x330] sm:$0xff] %v3540_v23  ;;  %3541 = vtanh.f32 %v2242_v22 }
 0x3c4   : > { %3543 = vtanh.f32 %v2146_v8 }
 0x3c6   : > { %v2194_v9 = vpop.f32.mrf.mxu2  ;;  %v2243_v27 = vpop.f32.mrf.mxu3 }
 0x3c7   : > { %v2195_v24 = vadd.f32 %v2194_v9, %v4850_v44  ;;  %v2255_v25 = vpop.f32.mrf.mxu0  ;;  %v2304_v26 = vpop.f32.mrf.mxu1 }
 0x3c8   : > { %v2256_v32 = vadd.f32 %v2255_v25, %v4926_v30 }
 0x3c9   : > { %v3542_v29 = vpop.eup %3541  ;;  %v2244_v33 = vadd.f32 %v2243_v27, %v2195_v24 }
 0x3ca   : > { %v3544_v5 = vpop.eup %3543  ;;  %2560 = vst [vmem:[%s4374_s13 + $0x338] sm:$0xff] %v3542_v29  ;;  %v2305_v37 = vadd.f32 %v2304_v26, %v2256_v32 }
 0x3cb   : > { %2566 = vst [vmem:[%s4374_s13 + $0x368] sm:$0xff] %v3544_v5  ;;  %3545 = vtanh.f32 %v2244_v33 }
 0x3cc   : > { %3547 = vtanh.f32 %v2305_v37 }
 0x3cf   : > { %v2257_v31 = vpop.f32.mrf.mxu0  ;;  %v2306_v38 = vpop.f32.mrf.mxu1 }
 0x3d0   : > { %v2258_v44 = vadd.f32 %v2257_v31, %v4926_v30 }
 0x3d1   : > { %v3546_v35 = vpop.eup %3545 }
 0x3d2   : > { %v3548_v39 = vpop.eup %3547  ;;  %2567 = vst [vmem:[%s4374_s13 + $0x370] sm:$0xff] %v3546_v35  ;;  %v2307_v40 = vadd.f32 %v2306_v38, %v2258_v44  ;;  %v2339_v35 = vpop.f32.mrf.mxu3 }
 0x3d3   : > { %2463 = vst.msk [vmem:[%s4374_s13 + $0x30] sm:$0xff] %vm2462_vm3, %v3548_v39 }
 0x3d4   : > { %3549 = vtanh.f32 %v2307_v40 }
 0x3d7   : > { %v2260_v41 = vpop.f32.mrf.mxu0  ;;  %v2309_v42 = vpop.f32.mrf.mxu1 }
 0x3d8   : > { %v2261_v19 = vadd.f32 %v2260_v41, %v4926_v30 }
 0x3da   : > { %v3550_v20 = vpop.eup %3549  ;;  %v2310_v43 = vadd.f32 %v2309_v42, %v2261_v19 }
 0x3db   : > { %2470 = vst.msk [vmem:[%s4374_s13 + $0x68] sm:$0xff] %vm2462_vm3, %v3550_v20 }
 0x3dc   : > { %3551 = vtanh.f32 %v2310_v43  ;;  %v2341_v43 = vpop.f32.mrf.mxu3 }
 0x3df   : > { %v2262_v45 = vpop.f32.mrf.mxu0  ;;  %v2311_v1 = vpop.f32.mrf.mxu1 }
 0x3e0   : > { %v2263_v2 = vadd.f32 %v2262_v45, %v4926_v30 }
 0x3e2   : > { %v3552_v48 = vpop.eup %3551  ;;  %v2312_v49 = vadd.f32 %v2311_v1, %v2263_v2 }
 0x3e3   : > { %2477 = vst.msk [vmem:[%s4374_s13 + $0xa0] sm:$0xff] %vm2462_vm3, %v3552_v48 }
 0x3e4   : > { %3553 = vtanh.f32 %v2312_v49 }
 0x3e7   : > { %v2265_v50 = vpop.f32.mrf.mxu0  ;;  %v2314_v51 = vpop.f32.mrf.mxu1 }
 0x3e8   : > { %v2266_v28 = vadd.f32 %v2265_v50, %v4926_v30 }
 0x3ea   : > { %v3554_v52 = vpop.eup %3553  ;;  %v2315_v53 = vadd.f32 %v2314_v51, %v2266_v28 }
 0x3eb   : > { %2484 = vst.msk [vmem:[%s4374_s13 + $0xd8] sm:$0xff] %vm2462_vm3, %v3554_v52 }
 0x3ec   : > { %3555 = vtanh.f32 %v2315_v53 }
 0x3ef   : > { %v2267_v34 = vpop.f32.mrf.mxu0  ;;  %v2316_v54 = vpop.f32.mrf.mxu1 }
 0x3f0   : > { %v2268_v12 = vadd.f32 %v2267_v34, %v4926_v30 }
 0x3f2   : > { %v3556_v55 = vpop.eup %3555  ;;  %v2317_v56 = vadd.f32 %v2316_v54, %v2268_v12 }
 0x3f3   : > { %2491 = vst.msk [vmem:[%s4374_s13 + $0x110] sm:$0xff] %vm2462_vm3, %v3556_v55 }
 0x3f4   : > { %3557 = vtanh.f32 %v2317_v56 }
 0x3f7   : > { %v2270_v57 = vpop.f32.mrf.mxu0  ;;  %v2319_v60 = vpop.f32.mrf.mxu1 }
 0x3f8   : > { %v2271_v61 = vadd.f32 %v2270_v57, %v4926_v30 }
 0x3fa   : > { %v3558_v62 = vpop.eup %3557  ;;  %v2320_v46 = vadd.f32 %v2319_v60, %v2271_v61 }
 0x3fb   : > { %2498 = vst.msk [vmem:[%s4374_s13 + $0x148] sm:$0xff] %vm2462_vm3, %v3558_v62 }
 0x3fc   : > { %3559 = vtanh.f32 %v2320_v46 }
 0x3ff   : > { %v2272_v47 = vpop.f32.mrf.mxu0  ;;  %v2321_v0 = vpop.f32.mrf.mxu1 }
 0x400   : > { %v2273_v3 = vadd.f32 %v2272_v47, %v4926_v30 }
 0x402   : > { %v3560_v63 = vpop.eup %3559  ;;  %v2322_v4 = vadd.f32 %v2321_v0, %v2273_v3 }
 0x403   : > { %2505 = vst.msk [vmem:[%s4374_s13 + $0x180] sm:$0xff] %vm2462_vm3, %v3560_v63 }
 0x404   : > { %3561 = vtanh.f32 %v2322_v4 }
 0x407   : > { %v2275_v36 = vpop.f32.mrf.mxu0  ;;  %v2324_v6 = vpop.f32.mrf.mxu1 }
 0x408   : > { %v2276_v7 = vadd.f32 %v2275_v36, %v4926_v30 }
 0x40a   : > { %v3562_v10 = vpop.eup %3561  ;;  %v2325_v11 = vadd.f32 %v2324_v6, %v2276_v7 }
 0x40b   : > { %2512 = vst.msk [vmem:[%s4374_s13 + $0x1b8] sm:$0xff] %vm2462_vm3, %v3562_v10 }
 0x40c   : > { %3563 = vtanh.f32 %v2325_v11 }
 0x40f   : > { %v2277_v13 = vpop.f32.mrf.mxu0  ;;  %v2326_v14 = vpop.f32.mrf.mxu1 }
 0x410   : > { %v2278_v15 = vadd.f32 %v2277_v13, %v4926_v30 }
 0x412   : > { %v3564_v16 = vpop.eup %3563  ;;  %v2327_v17 = vadd.f32 %v2326_v14, %v2278_v15 }
 0x413   : > { %2519 = vst.msk [vmem:[%s4374_s13 + $0x1f0] sm:$0xff] %vm2462_vm3, %v3564_v16 }
 0x414   : > { %3565 = vtanh.f32 %v2327_v17 }
 0x417   : > { %v2280_v58 = vpop.f32.mrf.mxu0  ;;  %v2329_v59 = vpop.f32.mrf.mxu1 }
 0x418   : > { %v2281_v18 = vadd.f32 %v2280_v58, %v4926_v30 }
 0x41a   : > { %v3566_v21 = vpop.eup %3565  ;;  %v2330_v22 = vadd.f32 %v2329_v59, %v2281_v18 }
 0x41b   : > { %2526 = vst.msk [vmem:[%s4374_s13 + $0x228] sm:$0xff] %vm2462_vm3, %v3566_v21 }
 0x41c   : > { %3567 = vtanh.f32 %v2330_v22 }
 0x41f   : > { %v2282_v23 = vpop.f32.mrf.mxu0  ;;  %v2331_v8 = vpop.f32.mrf.mxu1 }
 0x420   : > { %v2283_v9 = vadd.f32 %v2282_v23, %v4926_v30 }
 0x422   : > { %v3568_v24 = vpop.eup %3567  ;;  %v2332_v25 = vadd.f32 %v2331_v8, %v2283_v9 }
 0x423   : > { %2533 = vst.msk [vmem:[%s4374_s13 + $0x260] sm:$0xff] %vm2462_vm3, %v3568_v24 }
 0x424   : > { %3569 = vtanh.f32 %v2332_v25 }
 0x427   : > { %v2285_v26 = vpop.f32.mrf.mxu0  ;;  %v2334_v27 = vpop.f32.mrf.mxu1 }
 0x428   : > { %v2286_v32 = vadd.f32 %v2285_v26, %v4926_v30 }
 0x42a   : > { %v3570_v29 = vpop.eup %3569  ;;  %v2335_v33 = vadd.f32 %v2334_v27, %v2286_v32 }
 0x42b   : > { %2540 = vst.msk [vmem:[%s4374_s13 + $0x298] sm:$0xff] %vm2462_vm3, %v3570_v29 }
 0x42c   : > { %3571 = vtanh.f32 %v2335_v33 }
 0x42f   : > { %v2287_v5 = vpop.f32.mrf.mxu0  ;;  %v2336_v31 = vpop.f32.mrf.mxu1 }
 0x430   : > { %v2288_v37 = vadd.f32 %v2287_v5, %v4926_v30 }
 0x432   : > { %v3572_v38 = vpop.eup %3571  ;;  %v2337_v44 = vadd.f32 %v2336_v31, %v2288_v37 }
 0x433   : > { %2547 = vst.msk [vmem:[%s4374_s13 + $0x2d0] sm:$0xff] %vm2462_vm3, %v3572_v38 }
 0x434   : > { %3573 = vtanh.f32 %v2337_v44 }
 0x437   : > { %v2290_v39 = vpop.f32.mrf.mxu0 }
 0x438   : > { %v2291_v40 = vadd.f32 %v2290_v39, %v4926_v30 }
 0x43a   : > { %v3574_v41 = vpop.eup %3573  ;;  %v2340_v42 = vadd.f32 %v2339_v35, %v2291_v40 }
 0x43b   : > { %2554 = vst.msk [vmem:[%s4374_s13 + $0x308] sm:$0xff] %vm2462_vm3, %v3574_v41 }
 0x43c   : > { %3575 = vtanh.f32 %v2340_v42 }
 0x43f   : > { %v2292_v19 = vpop.f32.mrf.mxu0 }
 0x440   : > { %v2293_v20 = vadd.f32 %v2292_v19, %v4926_v30 }
 0x442   : > { %v3576_v45 = vpop.eup %3575  ;;  %v2342_v1 = vadd.f32 %v2341_v43, %v2293_v20 }
 0x443   : > { %2561 = vst.msk [vmem:[%s4374_s13 + $0x340] sm:$0xff] %vm2462_vm3, %v3576_v45 }
 0x444   : > { %3577 = vtanh.f32 %v2342_v1 }
 0x44a   : > { %v3578_v2 = vpop.eup %3577 }
 0x44b   : > { %2568 = vst.msk [vmem:[%s4374_s13 + $0x378] sm:$0xff] %vm2462_vm3, %v3578_v2 }
 0x44c PF: > { %s19_s30 = sadd.s32 1, %s3586_s30  }
 0x44d   : > { %p16_p4 = scmp.ge.s32.totalorder %s19_s30, 4  }
 0x44f   :  { %18 = sbr.rel (!%p16_p4) target bundleno = 1 (0x1), region = 86 }

</bundles_post_ra>
